<compile_context>
chip_gen: v5e
topology: v5e:2x2
jax: 0.10.0
libtpu: 0.0.40
codegen_flags: <defaults>
</compile_context>

<pallas_src>
import math

import jax
import jax.numpy as jnp
from jax.experimental import pallas as pl
from jax.experimental.pallas import tpu as pltpu

INPUT_DIM = 32
D_MODEL = 32
NHEAD = 4
HEAD_DIM = D_MODEL // NHEAD
DFF = 64
NUM_LAYERS = 2
NUM_CLASSES = 4
LN_EPS = 1e-5
MAX_LEN = 64
OUT_PAD = 128          # lane-dense logits store; sliced back to NUM_CLASSES on host


def _layer_norm(x, w, b):
    mu = jnp.mean(x, axis=-1, keepdims=True)
    xc = x - mu
    var = jnp.mean(xc * xc, axis=-1, keepdims=True)
    inv = jax.lax.rsqrt(var + LN_EPS)
    return xc * inv * w + b


def transformer_kernel(x_ref, pe_ref, w_in_ref, b_in_ref,
                       wqkv_ref, bqkv_ref, wo_ref, bo_ref,
                       ln1w_ref, ln1b_ref, ln2w_ref, ln2b_ref,
                       w1_ref, b1_ref, w2_ref, b2_ref,
                       wout_ref, bout_ref, out_ref):
    bblk, T, din = x_ref.shape                     # static block shape
    R = bblk * T

    # ---- input projection on the flattened batch block; PE is host-pre-tiled ----
    x = x_ref[...].reshape(R, din)                                        # (R, Din)
    h = jnp.dot(x, w_in_ref[...], preferred_element_type=jnp.float32) + b_in_ref[...]
    h = h + pe_ref[...]                                                   # (R, D)

    # Hoist all weight loads out of the layer/head loops.
    wqkv_all, bqkv_all = wqkv_ref[...], bqkv_ref[...]
    wo_all, bo_all = wo_ref[...], bo_ref[...]
    ln1w_all, ln1b_all = ln1w_ref[...], ln1b_ref[...]
    ln2w_all, ln2b_all = ln2w_ref[...], ln2b_ref[...]
    w1_all, b1_all = w1_ref[...], b1_ref[...]
    w2_all, b2_all = w2_ref[...], b2_ref[...]

    scale = 1.0 / math.sqrt(HEAD_DIM)
    inv_t = 1.0 / T

    for l in range(NUM_LAYERS):
        # ---- multi-head self attention (post-LN encoder layer) ----
        # Fused QKV: one full-width matmul per layer (96 output lanes).
        qkv = jnp.dot(h, wqkv_all[l], preferred_element_type=jnp.float32) + bqkv_all[l]

        heads = []
        for hd in range(NHEAD):
            off = hd * HEAD_DIM
            qs = qkv[:, off:off + HEAD_DIM].reshape(bblk, T, HEAD_DIM)
            ks = qkv[:, D_MODEL + off:D_MODEL + off + HEAD_DIM].reshape(bblk, T, HEAD_DIM)
            vs = qkv[:, 2 * D_MODEL + off:2 * D_MODEL + off + HEAD_DIM].reshape(bblk, T, HEAD_DIM)

            s = jnp.einsum("bqd,bkd->bqk", qs, ks,
                           preferred_element_type=jnp.float32) * scale   # (Bblk,T,T)
            s = s - jnp.max(s, axis=-1, keepdims=True)
            p = jnp.exp(s)
            p = p * pl.reciprocal(jnp.sum(p, axis=-1, keepdims=True), approx=True)
            a = jnp.einsum("bqk,bkd->bqd", p, vs,
                           preferred_element_type=jnp.float32)           # (Bblk,T,HD)
            heads.append(a.reshape(R, HEAD_DIM))

        # merge heads (one 32-lane concat) and do ONE output projection matmul
        a_merged = jnp.concatenate(heads, axis=-1)                        # (R, D)
        attn = jnp.dot(a_merged, wo_all[l],
                       preferred_element_type=jnp.float32) + bo_all[l:l + 1]

        h = _layer_norm(h + attn, ln1w_all[l:l + 1], ln1b_all[l:l + 1])

        # ---- feed-forward ----
        ff = jnp.dot(h, w1_all[l], preferred_element_type=jnp.float32) + b1_all[l:l + 1]
        ff = jnp.maximum(ff, 0.0)
        ff = jnp.dot(ff, w2_all[l], preferred_element_type=jnp.float32) + b2_all[l:l + 1]

        h = _layer_norm(h + ff, ln2w_all[l:l + 1], ln2b_all[l:l + 1])

    # mean over sequence, then classifier head; one lane-dense (Bblk, 128) store.
    pooled = jnp.sum(h.reshape(bblk, T, D_MODEL), axis=1) * inv_t         # (Bblk, D)
    logits = jnp.dot(pooled, wout_ref[...],
                     preferred_element_type=jnp.float32) + bout_ref[...]  # (Bblk, 128)
    out_ref[...] = logits


def _full_spec(shape):
    # Grid-invariant block (whole array); Pallas skips the re-fetch when the block
    # index is unchanged across grid steps.
    n = len(shape)
    return pl.BlockSpec(shape, lambda i: (0,) * n)


def _device_vmem_bytes():
    try:
        info = pltpu.get_tpu_info()
        return int(getattr(info, "vmem_capacity_bytes", 64 << 20))
    except Exception:
        return 64 << 20      # conservative fallback (v7x physical per-TC)


def _vmem_limit_bytes():
    vmem = min(_device_vmem_bytes(), 128 << 20)
    return int(vmem * 3 // 4)          # 48 MiB on v7x, 96 MiB on v5e/v6e


def _choose_batch_block(B, T):
    vmem = _device_vmem_bytes()
    # rows of the flattened (R, D<=96) f32 activation per grid step;
    # bigger on v5e/v6e (128 MiB VMEM) than on v7x (64 MiB).
    rows_budget = 16384 if vmem >= (96 << 20) else 8192
    # cap the unrolled per-head (bblk, T, T) score intermediates too.
    score_budget = 8 << 20
    bblk_scores = max(1, score_budget // max(1, T * T * 4))
    bblk = max(1, min(B, rows_budget // max(T, 1), bblk_scores))
    if bblk >= B:
        if B >= 16:
            # make sure there are >=2 grid steps so the "parallel" batch axis can
            # shard across v7x's 2 TensorCores (near-free on single-TC chips).
            half = -(-B // 2)
            return -(-half // 8) * 8
        return B                                   # single block, no padding
    return max(8, (bblk // 8) * 8)                 # keep blocks sublane-aligned


def emotion_transformer_forward(melspec, params):
    """melspec: (B, input_dim, T) float32 — same layout the PyTorch forward receives."""
    B, din, T = melspec.shape
    x = jnp.transpose(melspec, (0, 2, 1)).astype(jnp.float32)             # (B, T, Din)

    bblk = _choose_batch_block(B, T)
    n_blocks = -(-B // bblk)
    b_pad = n_blocks * bblk
    if b_pad != B:
        x = jnp.concatenate([x, jnp.zeros((b_pad - B, T, din), jnp.float32)], axis=0)

    L = NUM_LAYERS

    # ---- host-side weight prep: (in, out) layout, fused QKV, pre-tiled PE ----
    pe_flat = jnp.tile(params["pe"][:T], (bblk, 1))                       # (bblk*T, D)
    w_in_t = params["w_in"].T                                             # (Din, D)

    wqkv = jnp.concatenate([jnp.swapaxes(params["wq"], -1, -2),
                            jnp.swapaxes(params["wk"], -1, -2),
                            jnp.swapaxes(params["wv"], -1, -2)], axis=-1)  # (L, D, 3D)
    bqkv = jnp.concatenate([params["bq"], params["bk"], params["bv"]],
                           axis=-1).reshape(L, 1, 3 * D_MODEL)             # (L, 1, 3D)
    wo_t = jnp.swapaxes(params["wo"], -1, -2)                              # (L, D, D)
    w1_t = jnp.swapaxes(params["w1"], -1, -2)                              # (L, D, DFF)
    w2_t = jnp.swapaxes(params["w2"], -1, -2)                              # (L, DFF, D)

    # classifier weight lane-padded to 128 output columns (lane-dense store)
    w_out_pad = jnp.zeros((D_MODEL, OUT_PAD), jnp.float32).at[:, :NUM_CLASSES].set(
        params["w_out"].T)
    b_out_pad = jnp.zeros((1, OUT_PAD), jnp.float32).at[:, :NUM_CLASSES].set(
        params["b_out"])

    inputs = [x, pe_flat, w_in_t, params["b_in"],
              wqkv, bqkv, wo_t, params["bo"],
              params["ln1w"], params["ln1b"], params["ln2w"], params["ln2b"],
              w1_t, params["b1"], w2_t, params["b2"],
              w_out_pad, b_out_pad]

    in_specs = [pl.BlockSpec((bblk, T, din), lambda i: (i, 0, 0))]
    in_specs += [_full_spec(a.shape) for a in inputs[1:]]

    out = pl.pallas_call(
        transformer_kernel,
        out_shape=jax.ShapeDtypeStruct((b_pad, OUT_PAD), jnp.float32),
        grid_spec=pltpu.PrefetchScalarGridSpec(
            num_scalar_prefetch=0,
            grid=(n_blocks,),
            in_specs=in_specs,
            out_specs=pl.BlockSpec((bblk, OUT_PAD), lambda i: (i, 0)),
        ),
        compiler_params=pltpu.CompilerParams(
            dimension_semantics=("parallel",),     # batch blocks are independent
            vmem_limit_bytes=_vmem_limit_bytes()),
    )(*inputs)
    return out[:B, :NUM_CLASSES]


def make_positional_encoding(max_len, d_model):
    position = jnp.arange(max_len, dtype=jnp.float32)[:, None]
    div_term = jnp.exp(jnp.arange(0, d_model, 2, dtype=jnp.float32)
                       * (-jnp.log(10000.0) / d_model))
    pe = jnp.zeros((max_len, d_model), jnp.float32)
    pe = pe.at[:, 0::2].set(jnp.sin(position * div_term))
    pe = pe.at[:, 1::2].set(jnp.cos(position * div_term))
    return pe


def init_params(key):
    ks = jax.random.split(key, 16)

    def nrm(k, shape, scale=0.05):
        return (scale * jax.random.normal(k, shape)).astype(jnp.float32)

    L, D = NUM_LAYERS, D_MODEL
    return dict(
        pe=make_positional_encoding(MAX_LEN, D),
        w_in=nrm(ks[0], (D, INPUT_DIM)),
        b_in=nrm(ks[1], (1, D)),
        wq=nrm(ks[2], (L, D, D)), bq=nrm(ks[3], (L, D)),
        wk=nrm(ks[4], (L, D, D)), bk=nrm(ks[5], (L, D)),
        wv=nrm(ks[6], (L, D, D)), bv=nrm(ks[7], (L, D)),
        wo=nrm(ks[8], (L, D, D)), bo=nrm(ks[9], (L, D)),
        ln1w=jnp.ones((L, D), jnp.float32), ln1b=jnp.zeros((L, D), jnp.float32),
        ln2w=jnp.ones((L, D), jnp.float32), ln2b=jnp.zeros((L, D), jnp.float32),
        w1=nrm(ks[10], (L, DFF, D)), b1=nrm(ks[11], (L, DFF)),
        w2=nrm(ks[12], (L, D, DFF)), b2=nrm(ks[13], (L, D)),
        w_out=nrm(ks[14], (NUM_CLASSES, D)),
        b_out=nrm(ks[15], (1, NUM_CLASSES)),
    )


def reference_forward(melspec, params):
    """Pure-JAX reference mirroring the PyTorch graph (eval mode)."""
    x = jnp.transpose(melspec, (0, 2, 1))
    h = x @ params["w_in"].T + params["b_in"]
    B, T, _ = h.shape
    h = h + params["pe"][:T][None]
    for l in range(NUM_LAYERS):
        q = h @ params["wq"][l].T + params["bq"][l]
        k = h @ params["wk"][l].T + params["bk"][l]
        v = h @ params["wv"][l].T + params["bv"][l]

        def split_heads(t):
            return t.reshape(B, T, NHEAD, HEAD_DIM).transpose(0, 2, 1, 3)

        qh, kh, vh = split_heads(q), split_heads(k), split_heads(v)
        s = jnp.einsum("bhqd,bhkd->bhqk", qh, kh) / math.sqrt(HEAD_DIM)
        p = jax.nn.softmax(s, axis=-1)
        a = jnp.einsum("bhqk,bhkd->bhqd", p, vh)
        a = a.transpose(0, 2, 1, 3).reshape(B, T, D_MODEL)
        a = a @ params["wo"][l].T + params["bo"][l]
        h = _layer_norm(h + a, params["ln1w"][l], params["ln1b"][l])
        ff = jax.nn.relu(h @ params["w1"][l].T + params["b1"][l])
        ff = ff @ params["w2"][l].T + params["b2"][l]
        h = _layer_norm(h + ff, params["ln2w"][l], params["ln2b"][l])
    pooled = h.mean(axis=1)
    return pooled @ params["w_out"].T + params["b_out"]


if __name__ == "__main__":
    key = jax.random.PRNGKey(0)
    k_param, k_data = jax.random.split(key)

    params = init_params(k_param)

    B, T = 2, 8
    melspec = jax.random.normal(k_data, (B, INPUT_DIM, T), dtype=jnp.float32)

    logits = jax.block_until_ready(emotion_transformer_forward(melspec, params))
    ref = jax.block_until_ready(reference_forward(melspec, params))

    assert logits.shape == (B, NUM_CLASSES)
    # 2e-2 tolerance: kernel and reference both run DEFAULT (bf16-pass) matmul
    # precision but with different fusion/ordering, plus the EUP approximate
    # reciprocal in the softmax normalization.
    assert jnp.allclose(logits, ref, atol=2e-2, rtol=2e-2), (
        f"mismatch: max abs err {jnp.max(jnp.abs(logits - ref))}")

    print("KERNEL_OK")
</pallas_src>

<mosaic_0001>
module attributes {stable_mosaic.version = 11 : i64} {
  func.func @transformer_kernel(%arg0: i32, %arg1: memref<2x8x32xf32, #tpu.memory_space<vmem>>, %arg2: memref<16x32xf32, #tpu.memory_space<vmem>>, %arg3: memref<32x32xf32, #tpu.memory_space<vmem>>, %arg4: memref<1x32xf32, #tpu.memory_space<vmem>>, %arg5: memref<2x32x96xf32, #tpu.memory_space<vmem>>, %arg6: memref<2x1x96xf32, #tpu.memory_space<vmem>>, %arg7: memref<2x32x32xf32, #tpu.memory_space<vmem>>, %arg8: memref<2x32xf32, #tpu.memory_space<vmem>>, %arg9: memref<2x32xf32, #tpu.memory_space<vmem>>, %arg10: memref<2x32xf32, #tpu.memory_space<vmem>>, %arg11: memref<2x32xf32, #tpu.memory_space<vmem>>, %arg12: memref<2x32xf32, #tpu.memory_space<vmem>>, %arg13: memref<2x32x64xf32, #tpu.memory_space<vmem>>, %arg14: memref<2x64xf32, #tpu.memory_space<vmem>>, %arg15: memref<2x64x32xf32, #tpu.memory_space<vmem>>, %arg16: memref<2x32xf32, #tpu.memory_space<vmem>>, %arg17: memref<32x128xf32, #tpu.memory_space<vmem>>, %arg18: memref<1x128xf32, #tpu.memory_space<vmem>>, %arg19: memref<2x128xf32, #tpu.memory_space<vmem>>) attributes {dimension_semantics = [#tpu.dimension_semantics<parallel>], iteration_bounds = array<i64: 1>, scalar_prefetch = 0 : i64, scratch_operands = 0 : i64, tpu.core_type = #tpu.core_type<tc>, window_params = [{transform_indices = @transform_0, window_bounds = array<i64: 2, 8, 32>}, {pipeline_mode = #tpu.pipeline_mode<synchronous>, transform_indices = @transform_1, window_bounds = array<i64: 16, 32>}, {pipeline_mode = #tpu.pipeline_mode<synchronous>, transform_indices = @transform_2, window_bounds = array<i64: 32, 32>}, {pipeline_mode = #tpu.pipeline_mode<synchronous>, transform_indices = @transform_3, window_bounds = array<i64: 1, 32>}, {pipeline_mode = #tpu.pipeline_mode<synchronous>, transform_indices = @transform_4, window_bounds = array<i64: 2, 32, 96>}, {pipeline_mode = #tpu.pipeline_mode<synchronous>, transform_indices = @transform_5, window_bounds = array<i64: 2, 1, 96>}, {pipeline_mode = #tpu.pipeline_mode<synchronous>, transform_indices = @transform_6, window_bounds = array<i64: 2, 32, 32>}, {pipeline_mode = #tpu.pipeline_mode<synchronous>, transform_indices = @transform_7, window_bounds = array<i64: 2, 32>}, {pipeline_mode = #tpu.pipeline_mode<synchronous>, transform_indices = @transform_8, window_bounds = array<i64: 2, 32>}, {pipeline_mode = #tpu.pipeline_mode<synchronous>, transform_indices = @transform_9, window_bounds = array<i64: 2, 32>}, {pipeline_mode = #tpu.pipeline_mode<synchronous>, transform_indices = @transform_10, window_bounds = array<i64: 2, 32>}, {pipeline_mode = #tpu.pipeline_mode<synchronous>, transform_indices = @transform_11, window_bounds = array<i64: 2, 32>}, {pipeline_mode = #tpu.pipeline_mode<synchronous>, transform_indices = @transform_12, window_bounds = array<i64: 2, 32, 64>}, {pipeline_mode = #tpu.pipeline_mode<synchronous>, transform_indices = @transform_13, window_bounds = array<i64: 2, 64>}, {pipeline_mode = #tpu.pipeline_mode<synchronous>, transform_indices = @transform_14, window_bounds = array<i64: 2, 64, 32>}, {pipeline_mode = #tpu.pipeline_mode<synchronous>, transform_indices = @transform_15, window_bounds = array<i64: 2, 32>}, {pipeline_mode = #tpu.pipeline_mode<synchronous>, transform_indices = @transform_16, window_bounds = array<i64: 32, 128>}, {pipeline_mode = #tpu.pipeline_mode<synchronous>, transform_indices = @transform_17, window_bounds = array<i64: 1, 128>}, {transform_indices = @transform_18, window_bounds = array<i64: 2, 128>}]} {
    %c0 = arith.constant 0 : index
    %c0_0 = arith.constant 0 : index
    %c0_1 = arith.constant 0 : index
    %0 = vector.load %arg1[%c0, %c0_0, %c0_1] : memref<2x8x32xf32, #tpu.memory_space<vmem>>, vector<2x8x32xf32>
    %1 = vector.shape_cast %0 : vector<2x8x32xf32> to vector<16x32xf32>
    %c0_2 = arith.constant 0 : index
    %c0_3 = arith.constant 0 : index
    %2 = vector.load %arg3[%c0_2, %c0_3] : memref<32x32xf32, #tpu.memory_space<vmem>>, vector<32x32xf32>
    %cst = arith.constant dense<0.000000e+00> : vector<16x32xf32>
    %3 = tpu.matmul %1, %2, %cst {dimension_numbers = #tpu.dot_dimension_numbers<[1], [0], [0], [1], [0, 0, 1, 1], [], []>} : vector<16x32xf32>, vector<32x32xf32>, vector<16x32xf32> -> vector<16x32xf32>
    %c0_4 = arith.constant 0 : index
    %c0_5 = arith.constant 0 : index
    %4 = vector.load %arg4[%c0_4, %c0_5] : memref<1x32xf32, #tpu.memory_space<vmem>>, vector<1x32xf32>
    %5 = vector.broadcast %4 : vector<1x32xf32> to vector<16x32xf32>
    %6 = arith.addf %3, %5 : vector<16x32xf32>
    %c0_6 = arith.constant 0 : index
    %c0_7 = arith.constant 0 : index
    %7 = vector.load %arg2[%c0_6, %c0_7] : memref<16x32xf32, #tpu.memory_space<vmem>>, vector<16x32xf32>
    %8 = arith.addf %6, %7 : vector<16x32xf32>
    %c0_8 = arith.constant 0 : index
    %c0_9 = arith.constant 0 : index
    %c0_10 = arith.constant 0 : index
    %9 = vector.load %arg5[%c0_8, %c0_9, %c0_10] : memref<2x32x96xf32, #tpu.memory_space<vmem>>, vector<2x32x96xf32>
    %c0_11 = arith.constant 0 : index
    %c0_12 = arith.constant 0 : index
    %c0_13 = arith.constant 0 : index
    %10 = vector.load %arg6[%c0_11, %c0_12, %c0_13] : memref<2x1x96xf32, #tpu.memory_space<vmem>>, vector<2x1x96xf32>
    %c0_14 = arith.constant 0 : index
    %c0_15 = arith.constant 0 : index
    %c0_16 = arith.constant 0 : index
    %11 = vector.load %arg7[%c0_14, %c0_15, %c0_16] : memref<2x32x32xf32, #tpu.memory_space<vmem>>, vector<2x32x32xf32>
    %c0_17 = arith.constant 0 : index
    %c0_18 = arith.constant 0 : index
    %12 = vector.load %arg8[%c0_17, %c0_18] : memref<2x32xf32, #tpu.memory_space<vmem>>, vector<2x32xf32>
    %c0_19 = arith.constant 0 : index
    %c0_20 = arith.constant 0 : index
    %13 = vector.load %arg9[%c0_19, %c0_20] : memref<2x32xf32, #tpu.memory_space<vmem>>, vector<2x32xf32>
    %c0_21 = arith.constant 0 : index
    %c0_22 = arith.constant 0 : index
    %14 = vector.load %arg10[%c0_21, %c0_22] : memref<2x32xf32, #tpu.memory_space<vmem>>, vector<2x32xf32>
    %c0_23 = arith.constant 0 : index
    %c0_24 = arith.constant 0 : index
    %15 = vector.load %arg11[%c0_23, %c0_24] : memref<2x32xf32, #tpu.memory_space<vmem>>, vector<2x32xf32>
    %c0_25 = arith.constant 0 : index
    %c0_26 = arith.constant 0 : index
    %16 = vector.load %arg12[%c0_25, %c0_26] : memref<2x32xf32, #tpu.memory_space<vmem>>, vector<2x32xf32>
    %c0_27 = arith.constant 0 : index
    %c0_28 = arith.constant 0 : index
    %c0_29 = arith.constant 0 : index
    %17 = vector.load %arg13[%c0_27, %c0_28, %c0_29] : memref<2x32x64xf32, #tpu.memory_space<vmem>>, vector<2x32x64xf32>
    %c0_30 = arith.constant 0 : index
    %c0_31 = arith.constant 0 : index
    %18 = vector.load %arg14[%c0_30, %c0_31] : memref<2x64xf32, #tpu.memory_space<vmem>>, vector<2x64xf32>
    %c0_32 = arith.constant 0 : index
    %c0_33 = arith.constant 0 : index
    %c0_34 = arith.constant 0 : index
    %19 = vector.load %arg15[%c0_32, %c0_33, %c0_34] : memref<2x64x32xf32, #tpu.memory_space<vmem>>, vector<2x64x32xf32>
    %c0_35 = arith.constant 0 : index
    %c0_36 = arith.constant 0 : index
    %20 = vector.load %arg16[%c0_35, %c0_36] : memref<2x32xf32, #tpu.memory_space<vmem>>, vector<2x32xf32>
    %21 = vector.extract_strided_slice %9 {offsets = [0, 0, 0], sizes = [1, 32, 96], strides = [1, 1, 1]} : vector<2x32x96xf32> to vector<1x32x96xf32>
    %22 = vector.shape_cast %21 : vector<1x32x96xf32> to vector<32x96xf32>
    %cst_37 = arith.constant dense<0.000000e+00> : vector<16x96xf32>
    %23 = tpu.matmul %8, %22, %cst_37 {dimension_numbers = #tpu.dot_dimension_numbers<[1], [0], [0], [1], [0, 0, 1, 1], [], []>} : vector<16x32xf32>, vector<32x96xf32>, vector<16x96xf32> -> vector<16x96xf32>
    %24 = vector.extract_strided_slice %10 {offsets = [0, 0, 0], sizes = [1, 1, 96], strides = [1, 1, 1]} : vector<2x1x96xf32> to vector<1x1x96xf32>
    %25 = vector.shape_cast %24 : vector<1x1x96xf32> to vector<1x96xf32>
    %26 = vector.broadcast %25 : vector<1x96xf32> to vector<16x96xf32>
    %27 = arith.addf %23, %26 : vector<16x96xf32>
    %28 = vector.extract_strided_slice %27 {offsets = [0, 0], sizes = [16, 8], strides = [1, 1]} : vector<16x96xf32> to vector<16x8xf32>
    %29 = vector.shape_cast %28 : vector<16x8xf32> to vector<2x8x8xf32>
    %30 = vector.extract_strided_slice %27 {offsets = [0, 32], sizes = [16, 8], strides = [1, 1]} : vector<16x96xf32> to vector<16x8xf32>
    %31 = vector.shape_cast %30 : vector<16x8xf32> to vector<2x8x8xf32>
    %32 = vector.extract_strided_slice %27 {offsets = [0, 64], sizes = [16, 8], strides = [1, 1]} : vector<16x96xf32> to vector<16x8xf32>
    %33 = vector.shape_cast %32 : vector<16x8xf32> to vector<2x8x8xf32>
    "tpu.trace_start"() <{level = 10 : i32, message = "bqd,bkd->bqk"}> : () -> ()
    %cst_38 = arith.constant dense<0.000000e+00> : vector<2x8x8xf32>
    %34 = tpu.matmul %29, %31, %cst_38 {dimension_numbers = #tpu.dot_dimension_numbers<[2], [2], [1], [1], [0, 0, 0, 1, 1, 1], [0], [0]>} : vector<2x8x8xf32>, vector<2x8x8xf32>, vector<2x8x8xf32> -> vector<2x8x8xf32>
    "tpu.trace_stop"() : () -> ()
    %cst_39 = arith.constant 0.353553385 : f32
    %35 = vector.broadcast %cst_39 : f32 to vector<2x8x8xf32>
    %36 = arith.mulf %34, %35 : vector<2x8x8xf32>
    %cst_40 = arith.constant dense<0xFF800000> : vector<2x8xf32>
    %37 = vector.multi_reduction <maximumf>, %36, %cst_40 [2] : vector<2x8x8xf32> to vector<2x8xf32>
    %38 = vector.shape_cast %37 : vector<2x8xf32> to vector<2x8x1xf32>
    %39 = vector.broadcast %38 : vector<2x8x1xf32> to vector<2x8x8xf32>
    %40 = arith.subf %36, %39 : vector<2x8x8xf32>
    %41 = math.exp %40 : vector<2x8x8xf32>
    %cst_41 = arith.constant dense<0.000000e+00> : vector<2x8xf32>
    %42 = vector.multi_reduction <add>, %41, %cst_41 [2] : vector<2x8x8xf32> to vector<2x8xf32>
    %43 = vector.shape_cast %42 : vector<2x8xf32> to vector<2x8x1xf32>
    %44 = tpu.reciprocal %43 {approx = true} : vector<2x8x1xf32> -> vector<2x8x1xf32>
    %45 = vector.broadcast %44 : vector<2x8x1xf32> to vector<2x8x8xf32>
    %46 = arith.mulf %41, %45 : vector<2x8x8xf32>
    "tpu.trace_start"() <{level = 10 : i32, message = "bqk,bkd->bqd"}> : () -> ()
    %cst_42 = arith.constant dense<0.000000e+00> : vector<2x8x8xf32>
    %47 = tpu.matmul %46, %33, %cst_42 {dimension_numbers = #tpu.dot_dimension_numbers<[2], [1], [1], [2], [0, 0, 0, 1, 1, 2], [0], [0]>} : vector<2x8x8xf32>, vector<2x8x8xf32>, vector<2x8x8xf32> -> vector<2x8x8xf32>
    "tpu.trace_stop"() : () -> ()
    %48 = vector.shape_cast %47 : vector<2x8x8xf32> to vector<16x8xf32>
    %49 = vector.extract_strided_slice %27 {offsets = [0, 8], sizes = [16, 8], strides = [1, 1]} : vector<16x96xf32> to vector<16x8xf32>
    %50 = vector.shape_cast %49 : vector<16x8xf32> to vector<2x8x8xf32>
    %51 = vector.extract_strided_slice %27 {offsets = [0, 40], sizes = [16, 8], strides = [1, 1]} : vector<16x96xf32> to vector<16x8xf32>
    %52 = vector.shape_cast %51 : vector<16x8xf32> to vector<2x8x8xf32>
    %53 = vector.extract_strided_slice %27 {offsets = [0, 72], sizes = [16, 8], strides = [1, 1]} : vector<16x96xf32> to vector<16x8xf32>
    %54 = vector.shape_cast %53 : vector<16x8xf32> to vector<2x8x8xf32>
    "tpu.trace_start"() <{level = 10 : i32, message = "bqd,bkd->bqk"}> : () -> ()
    %cst_43 = arith.constant dense<0.000000e+00> : vector<2x8x8xf32>
    %55 = tpu.matmul %50, %52, %cst_43 {dimension_numbers = #tpu.dot_dimension_numbers<[2], [2], [1], [1], [0, 0, 0, 1, 1, 1], [0], [0]>} : vector<2x8x8xf32>, vector<2x8x8xf32>, vector<2x8x8xf32> -> vector<2x8x8xf32>
    "tpu.trace_stop"() : () -> ()
    %cst_44 = arith.constant 0.353553385 : f32
    %56 = vector.broadcast %cst_44 : f32 to vector<2x8x8xf32>
    %57 = arith.mulf %55, %56 : vector<2x8x8xf32>
    %cst_45 = arith.constant dense<0xFF800000> : vector<2x8xf32>
    %58 = vector.multi_reduction <maximumf>, %57, %cst_45 [2] : vector<2x8x8xf32> to vector<2x8xf32>
    %59 = vector.shape_cast %58 : vector<2x8xf32> to vector<2x8x1xf32>
    %60 = vector.broadcast %59 : vector<2x8x1xf32> to vector<2x8x8xf32>
    %61 = arith.subf %57, %60 : vector<2x8x8xf32>
    %62 = math.exp %61 : vector<2x8x8xf32>
    %cst_46 = arith.constant dense<0.000000e+00> : vector<2x8xf32>
    %63 = vector.multi_reduction <add>, %62, %cst_46 [2] : vector<2x8x8xf32> to vector<2x8xf32>
    %64 = vector.shape_cast %63 : vector<2x8xf32> to vector<2x8x1xf32>
    %65 = tpu.reciprocal %64 {approx = true} : vector<2x8x1xf32> -> vector<2x8x1xf32>
    %66 = vector.broadcast %65 : vector<2x8x1xf32> to vector<2x8x8xf32>
    %67 = arith.mulf %62, %66 : vector<2x8x8xf32>
    "tpu.trace_start"() <{level = 10 : i32, message = "bqk,bkd->bqd"}> : () -> ()
    %cst_47 = arith.constant dense<0.000000e+00> : vector<2x8x8xf32>
    %68 = tpu.matmul %67, %54, %cst_47 {dimension_numbers = #tpu.dot_dimension_numbers<[2], [1], [1], [2], [0, 0, 0, 1, 1, 2], [0], [0]>} : vector<2x8x8xf32>, vector<2x8x8xf32>, vector<2x8x8xf32> -> vector<2x8x8xf32>
    "tpu.trace_stop"() : () -> ()
    %69 = vector.shape_cast %68 : vector<2x8x8xf32> to vector<16x8xf32>
    %70 = vector.extract_strided_slice %27 {offsets = [0, 16], sizes = [16, 8], strides = [1, 1]} : vector<16x96xf32> to vector<16x8xf32>
    %71 = vector.shape_cast %70 : vector<16x8xf32> to vector<2x8x8xf32>
    %72 = vector.extract_strided_slice %27 {offsets = [0, 48], sizes = [16, 8], strides = [1, 1]} : vector<16x96xf32> to vector<16x8xf32>
    %73 = vector.shape_cast %72 : vector<16x8xf32> to vector<2x8x8xf32>
    %74 = vector.extract_strided_slice %27 {offsets = [0, 80], sizes = [16, 8], strides = [1, 1]} : vector<16x96xf32> to vector<16x8xf32>
    %75 = vector.shape_cast %74 : vector<16x8xf32> to vector<2x8x8xf32>
    "tpu.trace_start"() <{level = 10 : i32, message = "bqd,bkd->bqk"}> : () -> ()
    %cst_48 = arith.constant dense<0.000000e+00> : vector<2x8x8xf32>
    %76 = tpu.matmul %71, %73, %cst_48 {dimension_numbers = #tpu.dot_dimension_numbers<[2], [2], [1], [1], [0, 0, 0, 1, 1, 1], [0], [0]>} : vector<2x8x8xf32>, vector<2x8x8xf32>, vector<2x8x8xf32> -> vector<2x8x8xf32>
    "tpu.trace_stop"() : () -> ()
    %cst_49 = arith.constant 0.353553385 : f32
    %77 = vector.broadcast %cst_49 : f32 to vector<2x8x8xf32>
    %78 = arith.mulf %76, %77 : vector<2x8x8xf32>
    %cst_50 = arith.constant dense<0xFF800000> : vector<2x8xf32>
    %79 = vector.multi_reduction <maximumf>, %78, %cst_50 [2] : vector<2x8x8xf32> to vector<2x8xf32>
    %80 = vector.shape_cast %79 : vector<2x8xf32> to vector<2x8x1xf32>
    %81 = vector.broadcast %80 : vector<2x8x1xf32> to vector<2x8x8xf32>
    %82 = arith.subf %78, %81 : vector<2x8x8xf32>
    %83 = math.exp %82 : vector<2x8x8xf32>
    %cst_51 = arith.constant dense<0.000000e+00> : vector<2x8xf32>
    %84 = vector.multi_reduction <add>, %83, %cst_51 [2] : vector<2x8x8xf32> to vector<2x8xf32>
    %85 = vector.shape_cast %84 : vector<2x8xf32> to vector<2x8x1xf32>
    %86 = tpu.reciprocal %85 {approx = true} : vector<2x8x1xf32> -> vector<2x8x1xf32>
    %87 = vector.broadcast %86 : vector<2x8x1xf32> to vector<2x8x8xf32>
    %88 = arith.mulf %83, %87 : vector<2x8x8xf32>
    "tpu.trace_start"() <{level = 10 : i32, message = "bqk,bkd->bqd"}> : () -> ()
    %cst_52 = arith.constant dense<0.000000e+00> : vector<2x8x8xf32>
    %89 = tpu.matmul %88, %75, %cst_52 {dimension_numbers = #tpu.dot_dimension_numbers<[2], [1], [1], [2], [0, 0, 0, 1, 1, 2], [0], [0]>} : vector<2x8x8xf32>, vector<2x8x8xf32>, vector<2x8x8xf32> -> vector<2x8x8xf32>
    "tpu.trace_stop"() : () -> ()
    %90 = vector.shape_cast %89 : vector<2x8x8xf32> to vector<16x8xf32>
    %91 = vector.extract_strided_slice %27 {offsets = [0, 24], sizes = [16, 8], strides = [1, 1]} : vector<16x96xf32> to vector<16x8xf32>
    %92 = vector.shape_cast %91 : vector<16x8xf32> to vector<2x8x8xf32>
    %93 = vector.extract_strided_slice %27 {offsets = [0, 56], sizes = [16, 8], strides = [1, 1]} : vector<16x96xf32> to vector<16x8xf32>
    %94 = vector.shape_cast %93 : vector<16x8xf32> to vector<2x8x8xf32>
    %95 = vector.extract_strided_slice %27 {offsets = [0, 88], sizes = [16, 8], strides = [1, 1]} : vector<16x96xf32> to vector<16x8xf32>
    %96 = vector.shape_cast %95 : vector<16x8xf32> to vector<2x8x8xf32>
    "tpu.trace_start"() <{level = 10 : i32, message = "bqd,bkd->bqk"}> : () -> ()
    %cst_53 = arith.constant dense<0.000000e+00> : vector<2x8x8xf32>
    %97 = tpu.matmul %92, %94, %cst_53 {dimension_numbers = #tpu.dot_dimension_numbers<[2], [2], [1], [1], [0, 0, 0, 1, 1, 1], [0], [0]>} : vector<2x8x8xf32>, vector<2x8x8xf32>, vector<2x8x8xf32> -> vector<2x8x8xf32>
    "tpu.trace_stop"() : () -> ()
    %cst_54 = arith.constant 0.353553385 : f32
    %98 = vector.broadcast %cst_54 : f32 to vector<2x8x8xf32>
    %99 = arith.mulf %97, %98 : vector<2x8x8xf32>
    %cst_55 = arith.constant dense<0xFF800000> : vector<2x8xf32>
    %100 = vector.multi_reduction <maximumf>, %99, %cst_55 [2] : vector<2x8x8xf32> to vector<2x8xf32>
    %101 = vector.shape_cast %100 : vector<2x8xf32> to vector<2x8x1xf32>
    %102 = vector.broadcast %101 : vector<2x8x1xf32> to vector<2x8x8xf32>
    %103 = arith.subf %99, %102 : vector<2x8x8xf32>
    %104 = math.exp %103 : vector<2x8x8xf32>
    %cst_56 = arith.constant dense<0.000000e+00> : vector<2x8xf32>
    %105 = vector.multi_reduction <add>, %104, %cst_56 [2] : vector<2x8x8xf32> to vector<2x8xf32>
    %106 = vector.shape_cast %105 : vector<2x8xf32> to vector<2x8x1xf32>
    %107 = tpu.reciprocal %106 {approx = true} : vector<2x8x1xf32> -> vector<2x8x1xf32>
    %108 = vector.broadcast %107 : vector<2x8x1xf32> to vector<2x8x8xf32>
    %109 = arith.mulf %104, %108 : vector<2x8x8xf32>
    "tpu.trace_start"() <{level = 10 : i32, message = "bqk,bkd->bqd"}> : () -> ()
    %cst_57 = arith.constant dense<0.000000e+00> : vector<2x8x8xf32>
    %110 = tpu.matmul %109, %96, %cst_57 {dimension_numbers = #tpu.dot_dimension_numbers<[2], [1], [1], [2], [0, 0, 0, 1, 1, 2], [0], [0]>} : vector<2x8x8xf32>, vector<2x8x8xf32>, vector<2x8x8xf32> -> vector<2x8x8xf32>
    "tpu.trace_stop"() : () -> ()
    %111 = vector.shape_cast %110 : vector<2x8x8xf32> to vector<16x8xf32>
    %112 = tpu.concatenate %48, %69, %90, %111 in 1 : vector<16x8xf32>, vector<16x8xf32>, vector<16x8xf32>, vector<16x8xf32> -> vector<16x32xf32>
    %113 = vector.extract_strided_slice %11 {offsets = [0, 0, 0], sizes = [1, 32, 32], strides = [1, 1, 1]} : vector<2x32x32xf32> to vector<1x32x32xf32>
    %114 = vector.shape_cast %113 : vector<1x32x32xf32> to vector<32x32xf32>
    %cst_58 = arith.constant dense<0.000000e+00> : vector<16x32xf32>
    %115 = tpu.matmul %112, %114, %cst_58 {dimension_numbers = #tpu.dot_dimension_numbers<[1], [0], [0], [1], [0, 0, 1, 1], [], []>} : vector<16x32xf32>, vector<32x32xf32>, vector<16x32xf32> -> vector<16x32xf32>
    %116 = vector.extract_strided_slice %12 {offsets = [0, 0], sizes = [1, 32], strides = [1, 1]} : vector<2x32xf32> to vector<1x32xf32>
    %117 = vector.broadcast %116 : vector<1x32xf32> to vector<16x32xf32>
    %118 = arith.addf %115, %117 : vector<16x32xf32>
    %119 = arith.addf %8, %118 : vector<16x32xf32>
    %120 = vector.extract_strided_slice %13 {offsets = [0, 0], sizes = [1, 32], strides = [1, 1]} : vector<2x32xf32> to vector<1x32xf32>
    %121 = vector.extract_strided_slice %14 {offsets = [0, 0], sizes = [1, 32], strides = [1, 1]} : vector<2x32xf32> to vector<1x32xf32>
    %cst_59 = arith.constant dense<0.000000e+00> : vector<16xf32>
    %122 = vector.multi_reduction <add>, %119, %cst_59 [1] : vector<16x32xf32> to vector<16xf32>
    %123 = vector.shape_cast %122 : vector<16xf32> to vector<16x1xf32>
    %cst_60 = arith.constant 3.200000e+01 : f32
    %124 = vector.broadcast %cst_60 : f32 to vector<16x1xf32>
    %125 = arith.divf %123, %124 : vector<16x1xf32>
    %126 = vector.broadcast %125 : vector<16x1xf32> to vector<16x32xf32>
    %127 = arith.subf %119, %126 : vector<16x32xf32>
    %128 = arith.mulf %127, %127 : vector<16x32xf32>
    %cst_61 = arith.constant dense<0.000000e+00> : vector<16xf32>
    %129 = vector.multi_reduction <add>, %128, %cst_61 [1] : vector<16x32xf32> to vector<16xf32>
    %130 = vector.shape_cast %129 : vector<16xf32> to vector<16x1xf32>
    %cst_62 = arith.constant 3.200000e+01 : f32
    %131 = vector.broadcast %cst_62 : f32 to vector<16x1xf32>
    %132 = arith.divf %130, %131 : vector<16x1xf32>
    %cst_63 = arith.constant 9.99999974E-6 : f32
    %133 = vector.broadcast %cst_63 : f32 to vector<16x1xf32>
    %134 = arith.addf %132, %133 : vector<16x1xf32>
    %135 = math.rsqrt %134 : vector<16x1xf32>
    %136 = vector.broadcast %135 : vector<16x1xf32> to vector<16x32xf32>
    %137 = arith.mulf %127, %136 : vector<16x32xf32>
    %138 = vector.broadcast %120 : vector<1x32xf32> to vector<16x32xf32>
    %139 = arith.mulf %137, %138 : vector<16x32xf32>
    %140 = vector.broadcast %121 : vector<1x32xf32> to vector<16x32xf32>
    %141 = arith.addf %139, %140 : vector<16x32xf32>
    %142 = vector.extract_strided_slice %17 {offsets = [0, 0, 0], sizes = [1, 32, 64], strides = [1, 1, 1]} : vector<2x32x64xf32> to vector<1x32x64xf32>
    %143 = vector.shape_cast %142 : vector<1x32x64xf32> to vector<32x64xf32>
    %cst_64 = arith.constant dense<0.000000e+00> : vector<16x64xf32>
    %144 = tpu.matmul %141, %143, %cst_64 {dimension_numbers = #tpu.dot_dimension_numbers<[1], [0], [0], [1], [0, 0, 1, 1], [], []>} : vector<16x32xf32>, vector<32x64xf32>, vector<16x64xf32> -> vector<16x64xf32>
    %145 = vector.extract_strided_slice %18 {offsets = [0, 0], sizes = [1, 64], strides = [1, 1]} : vector<2x64xf32> to vector<1x64xf32>
    %146 = vector.broadcast %145 : vector<1x64xf32> to vector<16x64xf32>
    %147 = arith.addf %144, %146 : vector<16x64xf32>
    %cst_65 = arith.constant 0.000000e+00 : f32
    %148 = vector.broadcast %cst_65 : f32 to vector<16x64xf32>
    %149 = arith.maximumf %147, %148 : vector<16x64xf32>
    %150 = vector.extract_strided_slice %19 {offsets = [0, 0, 0], sizes = [1, 64, 32], strides = [1, 1, 1]} : vector<2x64x32xf32> to vector<1x64x32xf32>
    %151 = vector.shape_cast %150 : vector<1x64x32xf32> to vector<64x32xf32>
    %cst_66 = arith.constant dense<0.000000e+00> : vector<16x32xf32>
    %152 = tpu.matmul %149, %151, %cst_66 {dimension_numbers = #tpu.dot_dimension_numbers<[1], [0], [0], [1], [0, 0, 1, 1], [], []>} : vector<16x64xf32>, vector<64x32xf32>, vector<16x32xf32> -> vector<16x32xf32>
    %153 = vector.extract_strided_slice %20 {offsets = [0, 0], sizes = [1, 32], strides = [1, 1]} : vector<2x32xf32> to vector<1x32xf32>
    %154 = vector.broadcast %153 : vector<1x32xf32> to vector<16x32xf32>
    %155 = arith.addf %152, %154 : vector<16x32xf32>
    %156 = arith.addf %141, %155 : vector<16x32xf32>
    %157 = vector.extract_strided_slice %15 {offsets = [0, 0], sizes = [1, 32], strides = [1, 1]} : vector<2x32xf32> to vector<1x32xf32>
    %158 = vector.extract_strided_slice %16 {offsets = [0, 0], sizes = [1, 32], strides = [1, 1]} : vector<2x32xf32> to vector<1x32xf32>
    %cst_67 = arith.constant dense<0.000000e+00> : vector<16xf32>
    %159 = vector.multi_reduction <add>, %156, %cst_67 [1] : vector<16x32xf32> to vector<16xf32>
    %160 = vector.shape_cast %159 : vector<16xf32> to vector<16x1xf32>
    %cst_68 = arith.constant 3.200000e+01 : f32
    %161 = vector.broadcast %cst_68 : f32 to vector<16x1xf32>
    %162 = arith.divf %160, %161 : vector<16x1xf32>
    %163 = vector.broadcast %162 : vector<16x1xf32> to vector<16x32xf32>
    %164 = arith.subf %156, %163 : vector<16x32xf32>
    %165 = arith.mulf %164, %164 : vector<16x32xf32>
    %cst_69 = arith.constant dense<0.000000e+00> : vector<16xf32>
    %166 = vector.multi_reduction <add>, %165, %cst_69 [1] : vector<16x32xf32> to vector<16xf32>
    %167 = vector.shape_cast %166 : vector<16xf32> to vector<16x1xf32>
    %cst_70 = arith.constant 3.200000e+01 : f32
    %168 = vector.broadcast %cst_70 : f32 to vector<16x1xf32>
    %169 = arith.divf %167, %168 : vector<16x1xf32>
    %cst_71 = arith.constant 9.99999974E-6 : f32
    %170 = vector.broadcast %cst_71 : f32 to vector<16x1xf32>
    %171 = arith.addf %169, %170 : vector<16x1xf32>
    %172 = math.rsqrt %171 : vector<16x1xf32>
    %173 = vector.broadcast %172 : vector<16x1xf32> to vector<16x32xf32>
    %174 = arith.mulf %164, %173 : vector<16x32xf32>
    %175 = vector.broadcast %157 : vector<1x32xf32> to vector<16x32xf32>
    %176 = arith.mulf %174, %175 : vector<16x32xf32>
    %177 = vector.broadcast %158 : vector<1x32xf32> to vector<16x32xf32>
    %178 = arith.addf %176, %177 : vector<16x32xf32>
    %179 = vector.extract_strided_slice %9 {offsets = [1, 0, 0], sizes = [1, 32, 96], strides = [1, 1, 1]} : vector<2x32x96xf32> to vector<1x32x96xf32>
    %180 = vector.shape_cast %179 : vector<1x32x96xf32> to vector<32x96xf32>
    %cst_72 = arith.constant dense<0.000000e+00> : vector<16x96xf32>
    %181 = tpu.matmul %178, %180, %cst_72 {dimension_numbers = #tpu.dot_dimension_numbers<[1], [0], [0], [1], [0, 0, 1, 1], [], []>} : vector<16x32xf32>, vector<32x96xf32>, vector<16x96xf32> -> vector<16x96xf32>
    %182 = vector.extract_strided_slice %10 {offsets = [1, 0, 0], sizes = [1, 1, 96], strides = [1, 1, 1]} : vector<2x1x96xf32> to vector<1x1x96xf32>
    %183 = vector.shape_cast %182 : vector<1x1x96xf32> to vector<1x96xf32>
    %184 = vector.broadcast %183 : vector<1x96xf32> to vector<16x96xf32>
    %185 = arith.addf %181, %184 : vector<16x96xf32>
    %186 = vector.extract_strided_slice %185 {offsets = [0, 0], sizes = [16, 8], strides = [1, 1]} : vector<16x96xf32> to vector<16x8xf32>
    %187 = vector.shape_cast %186 : vector<16x8xf32> to vector<2x8x8xf32>
    %188 = vector.extract_strided_slice %185 {offsets = [0, 32], sizes = [16, 8], strides = [1, 1]} : vector<16x96xf32> to vector<16x8xf32>
    %189 = vector.shape_cast %188 : vector<16x8xf32> to vector<2x8x8xf32>
    %190 = vector.extract_strided_slice %185 {offsets = [0, 64], sizes = [16, 8], strides = [1, 1]} : vector<16x96xf32> to vector<16x8xf32>
    %191 = vector.shape_cast %190 : vector<16x8xf32> to vector<2x8x8xf32>
    "tpu.trace_start"() <{level = 10 : i32, message = "bqd,bkd->bqk"}> : () -> ()
    %cst_73 = arith.constant dense<0.000000e+00> : vector<2x8x8xf32>
    %192 = tpu.matmul %187, %189, %cst_73 {dimension_numbers = #tpu.dot_dimension_numbers<[2], [2], [1], [1], [0, 0, 0, 1, 1, 1], [0], [0]>} : vector<2x8x8xf32>, vector<2x8x8xf32>, vector<2x8x8xf32> -> vector<2x8x8xf32>
    "tpu.trace_stop"() : () -> ()
    %cst_74 = arith.constant 0.353553385 : f32
    %193 = vector.broadcast %cst_74 : f32 to vector<2x8x8xf32>
    %194 = arith.mulf %192, %193 : vector<2x8x8xf32>
    %cst_75 = arith.constant dense<0xFF800000> : vector<2x8xf32>
    %195 = vector.multi_reduction <maximumf>, %194, %cst_75 [2] : vector<2x8x8xf32> to vector<2x8xf32>
    %196 = vector.shape_cast %195 : vector<2x8xf32> to vector<2x8x1xf32>
    %197 = vector.broadcast %196 : vector<2x8x1xf32> to vector<2x8x8xf32>
    %198 = arith.subf %194, %197 : vector<2x8x8xf32>
    %199 = math.exp %198 : vector<2x8x8xf32>
    %cst_76 = arith.constant dense<0.000000e+00> : vector<2x8xf32>
    %200 = vector.multi_reduction <add>, %199, %cst_76 [2] : vector<2x8x8xf32> to vector<2x8xf32>
    %201 = vector.shape_cast %200 : vector<2x8xf32> to vector<2x8x1xf32>
    %202 = tpu.reciprocal %201 {approx = true} : vector<2x8x1xf32> -> vector<2x8x1xf32>
    %203 = vector.broadcast %202 : vector<2x8x1xf32> to vector<2x8x8xf32>
    %204 = arith.mulf %199, %203 : vector<2x8x8xf32>
    "tpu.trace_start"() <{level = 10 : i32, message = "bqk,bkd->bqd"}> : () -> ()
    %cst_77 = arith.constant dense<0.000000e+00> : vector<2x8x8xf32>
    %205 = tpu.matmul %204, %191, %cst_77 {dimension_numbers = #tpu.dot_dimension_numbers<[2], [1], [1], [2], [0, 0, 0, 1, 1, 2], [0], [0]>} : vector<2x8x8xf32>, vector<2x8x8xf32>, vector<2x8x8xf32> -> vector<2x8x8xf32>
    "tpu.trace_stop"() : () -> ()
    %206 = vector.shape_cast %205 : vector<2x8x8xf32> to vector<16x8xf32>
    %207 = vector.extract_strided_slice %185 {offsets = [0, 8], sizes = [16, 8], strides = [1, 1]} : vector<16x96xf32> to vector<16x8xf32>
    %208 = vector.shape_cast %207 : vector<16x8xf32> to vector<2x8x8xf32>
    %209 = vector.extract_strided_slice %185 {offsets = [0, 40], sizes = [16, 8], strides = [1, 1]} : vector<16x96xf32> to vector<16x8xf32>
    %210 = vector.shape_cast %209 : vector<16x8xf32> to vector<2x8x8xf32>
    %211 = vector.extract_strided_slice %185 {offsets = [0, 72], sizes = [16, 8], strides = [1, 1]} : vector<16x96xf32> to vector<16x8xf32>
    %212 = vector.shape_cast %211 : vector<16x8xf32> to vector<2x8x8xf32>
    "tpu.trace_start"() <{level = 10 : i32, message = "bqd,bkd->bqk"}> : () -> ()
    %cst_78 = arith.constant dense<0.000000e+00> : vector<2x8x8xf32>
    %213 = tpu.matmul %208, %210, %cst_78 {dimension_numbers = #tpu.dot_dimension_numbers<[2], [2], [1], [1], [0, 0, 0, 1, 1, 1], [0], [0]>} : vector<2x8x8xf32>, vector<2x8x8xf32>, vector<2x8x8xf32> -> vector<2x8x8xf32>
    "tpu.trace_stop"() : () -> ()
    %cst_79 = arith.constant 0.353553385 : f32
    %214 = vector.broadcast %cst_79 : f32 to vector<2x8x8xf32>
    %215 = arith.mulf %213, %214 : vector<2x8x8xf32>
    %cst_80 = arith.constant dense<0xFF800000> : vector<2x8xf32>
    %216 = vector.multi_reduction <maximumf>, %215, %cst_80 [2] : vector<2x8x8xf32> to vector<2x8xf32>
    %217 = vector.shape_cast %216 : vector<2x8xf32> to vector<2x8x1xf32>
    %218 = vector.broadcast %217 : vector<2x8x1xf32> to vector<2x8x8xf32>
    %219 = arith.subf %215, %218 : vector<2x8x8xf32>
    %220 = math.exp %219 : vector<2x8x8xf32>
    %cst_81 = arith.constant dense<0.000000e+00> : vector<2x8xf32>
    %221 = vector.multi_reduction <add>, %220, %cst_81 [2] : vector<2x8x8xf32> to vector<2x8xf32>
    %222 = vector.shape_cast %221 : vector<2x8xf32> to vector<2x8x1xf32>
    %223 = tpu.reciprocal %222 {approx = true} : vector<2x8x1xf32> -> vector<2x8x1xf32>
    %224 = vector.broadcast %223 : vector<2x8x1xf32> to vector<2x8x8xf32>
    %225 = arith.mulf %220, %224 : vector<2x8x8xf32>
    "tpu.trace_start"() <{level = 10 : i32, message = "bqk,bkd->bqd"}> : () -> ()
    %cst_82 = arith.constant dense<0.000000e+00> : vector<2x8x8xf32>
    %226 = tpu.matmul %225, %212, %cst_82 {dimension_numbers = #tpu.dot_dimension_numbers<[2], [1], [1], [2], [0, 0, 0, 1, 1, 2], [0], [0]>} : vector<2x8x8xf32>, vector<2x8x8xf32>, vector<2x8x8xf32> -> vector<2x8x8xf32>
    "tpu.trace_stop"() : () -> ()
    %227 = vector.shape_cast %226 : vector<2x8x8xf32> to vector<16x8xf32>
    %228 = vector.extract_strided_slice %185 {offsets = [0, 16], sizes = [16, 8], strides = [1, 1]} : vector<16x96xf32> to vector<16x8xf32>
    %229 = vector.shape_cast %228 : vector<16x8xf32> to vector<2x8x8xf32>
    %230 = vector.extract_strided_slice %185 {offsets = [0, 48], sizes = [16, 8], strides = [1, 1]} : vector<16x96xf32> to vector<16x8xf32>
    %231 = vector.shape_cast %230 : vector<16x8xf32> to vector<2x8x8xf32>
    %232 = vector.extract_strided_slice %185 {offsets = [0, 80], sizes = [16, 8], strides = [1, 1]} : vector<16x96xf32> to vector<16x8xf32>
    %233 = vector.shape_cast %232 : vector<16x8xf32> to vector<2x8x8xf32>
    "tpu.trace_start"() <{level = 10 : i32, message = "bqd,bkd->bqk"}> : () -> ()
    %cst_83 = arith.constant dense<0.000000e+00> : vector<2x8x8xf32>
    %234 = tpu.matmul %229, %231, %cst_83 {dimension_numbers = #tpu.dot_dimension_numbers<[2], [2], [1], [1], [0, 0, 0, 1, 1, 1], [0], [0]>} : vector<2x8x8xf32>, vector<2x8x8xf32>, vector<2x8x8xf32> -> vector<2x8x8xf32>
    "tpu.trace_stop"() : () -> ()
    %cst_84 = arith.constant 0.353553385 : f32
    %235 = vector.broadcast %cst_84 : f32 to vector<2x8x8xf32>
    %236 = arith.mulf %234, %235 : vector<2x8x8xf32>
    %cst_85 = arith.constant dense<0xFF800000> : vector<2x8xf32>
    %237 = vector.multi_reduction <maximumf>, %236, %cst_85 [2] : vector<2x8x8xf32> to vector<2x8xf32>
    %238 = vector.shape_cast %237 : vector<2x8xf32> to vector<2x8x1xf32>
    %239 = vector.broadcast %238 : vector<2x8x1xf32> to vector<2x8x8xf32>
    %240 = arith.subf %236, %239 : vector<2x8x8xf32>
    %241 = math.exp %240 : vector<2x8x8xf32>
    %cst_86 = arith.constant dense<0.000000e+00> : vector<2x8xf32>
    %242 = vector.multi_reduction <add>, %241, %cst_86 [2] : vector<2x8x8xf32> to vector<2x8xf32>
    %243 = vector.shape_cast %242 : vector<2x8xf32> to vector<2x8x1xf32>
    %244 = tpu.reciprocal %243 {approx = true} : vector<2x8x1xf32> -> vector<2x8x1xf32>
    %245 = vector.broadcast %244 : vector<2x8x1xf32> to vector<2x8x8xf32>
    %246 = arith.mulf %241, %245 : vector<2x8x8xf32>
    "tpu.trace_start"() <{level = 10 : i32, message = "bqk,bkd->bqd"}> : () -> ()
    %cst_87 = arith.constant dense<0.000000e+00> : vector<2x8x8xf32>
    %247 = tpu.matmul %246, %233, %cst_87 {dimension_numbers = #tpu.dot_dimension_numbers<[2], [1], [1], [2], [0, 0, 0, 1, 1, 2], [0], [0]>} : vector<2x8x8xf32>, vector<2x8x8xf32>, vector<2x8x8xf32> -> vector<2x8x8xf32>
    "tpu.trace_stop"() : () -> ()
    %248 = vector.shape_cast %247 : vector<2x8x8xf32> to vector<16x8xf32>
    %249 = vector.extract_strided_slice %185 {offsets = [0, 24], sizes = [16, 8], strides = [1, 1]} : vector<16x96xf32> to vector<16x8xf32>
    %250 = vector.shape_cast %249 : vector<16x8xf32> to vector<2x8x8xf32>
    %251 = vector.extract_strided_slice %185 {offsets = [0, 56], sizes = [16, 8], strides = [1, 1]} : vector<16x96xf32> to vector<16x8xf32>
    %252 = vector.shape_cast %251 : vector<16x8xf32> to vector<2x8x8xf32>
    %253 = vector.extract_strided_slice %185 {offsets = [0, 88], sizes = [16, 8], strides = [1, 1]} : vector<16x96xf32> to vector<16x8xf32>
    %254 = vector.shape_cast %253 : vector<16x8xf32> to vector<2x8x8xf32>
    "tpu.trace_start"() <{level = 10 : i32, message = "bqd,bkd->bqk"}> : () -> ()
    %cst_88 = arith.constant dense<0.000000e+00> : vector<2x8x8xf32>
    %255 = tpu.matmul %250, %252, %cst_88 {dimension_numbers = #tpu.dot_dimension_numbers<[2], [2], [1], [1], [0, 0, 0, 1, 1, 1], [0], [0]>} : vector<2x8x8xf32>, vector<2x8x8xf32>, vector<2x8x8xf32> -> vector<2x8x8xf32>
    "tpu.trace_stop"() : () -> ()
    %cst_89 = arith.constant 0.353553385 : f32
    %256 = vector.broadcast %cst_89 : f32 to vector<2x8x8xf32>
    %257 = arith.mulf %255, %256 : vector<2x8x8xf32>
    %cst_90 = arith.constant dense<0xFF800000> : vector<2x8xf32>
    %258 = vector.multi_reduction <maximumf>, %257, %cst_90 [2] : vector<2x8x8xf32> to vector<2x8xf32>
    %259 = vector.shape_cast %258 : vector<2x8xf32> to vector<2x8x1xf32>
    %260 = vector.broadcast %259 : vector<2x8x1xf32> to vector<2x8x8xf32>
    %261 = arith.subf %257, %260 : vector<2x8x8xf32>
    %262 = math.exp %261 : vector<2x8x8xf32>
    %cst_91 = arith.constant dense<0.000000e+00> : vector<2x8xf32>
    %263 = vector.multi_reduction <add>, %262, %cst_91 [2] : vector<2x8x8xf32> to vector<2x8xf32>
    %264 = vector.shape_cast %263 : vector<2x8xf32> to vector<2x8x1xf32>
    %265 = tpu.reciprocal %264 {approx = true} : vector<2x8x1xf32> -> vector<2x8x1xf32>
    %266 = vector.broadcast %265 : vector<2x8x1xf32> to vector<2x8x8xf32>
    %267 = arith.mulf %262, %266 : vector<2x8x8xf32>
    "tpu.trace_start"() <{level = 10 : i32, message = "bqk,bkd->bqd"}> : () -> ()
    %cst_92 = arith.constant dense<0.000000e+00> : vector<2x8x8xf32>
    %268 = tpu.matmul %267, %254, %cst_92 {dimension_numbers = #tpu.dot_dimension_numbers<[2], [1], [1], [2], [0, 0, 0, 1, 1, 2], [0], [0]>} : vector<2x8x8xf32>, vector<2x8x8xf32>, vector<2x8x8xf32> -> vector<2x8x8xf32>
    "tpu.trace_stop"() : () -> ()
    %269 = vector.shape_cast %268 : vector<2x8x8xf32> to vector<16x8xf32>
    %270 = tpu.concatenate %206, %227, %248, %269 in 1 : vector<16x8xf32>, vector<16x8xf32>, vector<16x8xf32>, vector<16x8xf32> -> vector<16x32xf32>
    %271 = vector.extract_strided_slice %11 {offsets = [1, 0, 0], sizes = [1, 32, 32], strides = [1, 1, 1]} : vector<2x32x32xf32> to vector<1x32x32xf32>
    %272 = vector.shape_cast %271 : vector<1x32x32xf32> to vector<32x32xf32>
    %cst_93 = arith.constant dense<0.000000e+00> : vector<16x32xf32>
    %273 = tpu.matmul %270, %272, %cst_93 {dimension_numbers = #tpu.dot_dimension_numbers<[1], [0], [0], [1], [0, 0, 1, 1], [], []>} : vector<16x32xf32>, vector<32x32xf32>, vector<16x32xf32> -> vector<16x32xf32>
    %274 = vector.extract_strided_slice %12 {offsets = [1, 0], sizes = [1, 32], strides = [1, 1]} : vector<2x32xf32> to vector<1x32xf32>
    %275 = vector.broadcast %274 : vector<1x32xf32> to vector<16x32xf32>
    %276 = arith.addf %273, %275 : vector<16x32xf32>
    %277 = arith.addf %178, %276 : vector<16x32xf32>
    %278 = vector.extract_strided_slice %13 {offsets = [1, 0], sizes = [1, 32], strides = [1, 1]} : vector<2x32xf32> to vector<1x32xf32>
    %279 = vector.extract_strided_slice %14 {offsets = [1, 0], sizes = [1, 32], strides = [1, 1]} : vector<2x32xf32> to vector<1x32xf32>
    %cst_94 = arith.constant dense<0.000000e+00> : vector<16xf32>
    %280 = vector.multi_reduction <add>, %277, %cst_94 [1] : vector<16x32xf32> to vector<16xf32>
    %281 = vector.shape_cast %280 : vector<16xf32> to vector<16x1xf32>
    %cst_95 = arith.constant 3.200000e+01 : f32
    %282 = vector.broadcast %cst_95 : f32 to vector<16x1xf32>
    %283 = arith.divf %281, %282 : vector<16x1xf32>
    %284 = vector.broadcast %283 : vector<16x1xf32> to vector<16x32xf32>
    %285 = arith.subf %277, %284 : vector<16x32xf32>
    %286 = arith.mulf %285, %285 : vector<16x32xf32>
    %cst_96 = arith.constant dense<0.000000e+00> : vector<16xf32>
    %287 = vector.multi_reduction <add>, %286, %cst_96 [1] : vector<16x32xf32> to vector<16xf32>
    %288 = vector.shape_cast %287 : vector<16xf32> to vector<16x1xf32>
    %cst_97 = arith.constant 3.200000e+01 : f32
    %289 = vector.broadcast %cst_97 : f32 to vector<16x1xf32>
    %290 = arith.divf %288, %289 : vector<16x1xf32>
    %cst_98 = arith.constant 9.99999974E-6 : f32
    %291 = vector.broadcast %cst_98 : f32 to vector<16x1xf32>
    %292 = arith.addf %290, %291 : vector<16x1xf32>
    %293 = math.rsqrt %292 : vector<16x1xf32>
    %294 = vector.broadcast %293 : vector<16x1xf32> to vector<16x32xf32>
    %295 = arith.mulf %285, %294 : vector<16x32xf32>
    %296 = vector.broadcast %278 : vector<1x32xf32> to vector<16x32xf32>
    %297 = arith.mulf %295, %296 : vector<16x32xf32>
    %298 = vector.broadcast %279 : vector<1x32xf32> to vector<16x32xf32>
    %299 = arith.addf %297, %298 : vector<16x32xf32>
    %300 = vector.extract_strided_slice %17 {offsets = [1, 0, 0], sizes = [1, 32, 64], strides = [1, 1, 1]} : vector<2x32x64xf32> to vector<1x32x64xf32>
    %301 = vector.shape_cast %300 : vector<1x32x64xf32> to vector<32x64xf32>
    %cst_99 = arith.constant dense<0.000000e+00> : vector<16x64xf32>
    %302 = tpu.matmul %299, %301, %cst_99 {dimension_numbers = #tpu.dot_dimension_numbers<[1], [0], [0], [1], [0, 0, 1, 1], [], []>} : vector<16x32xf32>, vector<32x64xf32>, vector<16x64xf32> -> vector<16x64xf32>
    %303 = vector.extract_strided_slice %18 {offsets = [1, 0], sizes = [1, 64], strides = [1, 1]} : vector<2x64xf32> to vector<1x64xf32>
    %304 = vector.broadcast %303 : vector<1x64xf32> to vector<16x64xf32>
    %305 = arith.addf %302, %304 : vector<16x64xf32>
    %cst_100 = arith.constant 0.000000e+00 : f32
    %306 = vector.broadcast %cst_100 : f32 to vector<16x64xf32>
    %307 = arith.maximumf %305, %306 : vector<16x64xf32>
    %308 = vector.extract_strided_slice %19 {offsets = [1, 0, 0], sizes = [1, 64, 32], strides = [1, 1, 1]} : vector<2x64x32xf32> to vector<1x64x32xf32>
    %309 = vector.shape_cast %308 : vector<1x64x32xf32> to vector<64x32xf32>
    %cst_101 = arith.constant dense<0.000000e+00> : vector<16x32xf32>
    %310 = tpu.matmul %307, %309, %cst_101 {dimension_numbers = #tpu.dot_dimension_numbers<[1], [0], [0], [1], [0, 0, 1, 1], [], []>} : vector<16x64xf32>, vector<64x32xf32>, vector<16x32xf32> -> vector<16x32xf32>
    %311 = vector.extract_strided_slice %20 {offsets = [1, 0], sizes = [1, 32], strides = [1, 1]} : vector<2x32xf32> to vector<1x32xf32>
    %312 = vector.broadcast %311 : vector<1x32xf32> to vector<16x32xf32>
    %313 = arith.addf %310, %312 : vector<16x32xf32>
    %314 = arith.addf %299, %313 : vector<16x32xf32>
    %315 = vector.extract_strided_slice %15 {offsets = [1, 0], sizes = [1, 32], strides = [1, 1]} : vector<2x32xf32> to vector<1x32xf32>
    %316 = vector.extract_strided_slice %16 {offsets = [1, 0], sizes = [1, 32], strides = [1, 1]} : vector<2x32xf32> to vector<1x32xf32>
    %cst_102 = arith.constant dense<0.000000e+00> : vector<16xf32>
    %317 = vector.multi_reduction <add>, %314, %cst_102 [1] : vector<16x32xf32> to vector<16xf32>
    %318 = vector.shape_cast %317 : vector<16xf32> to vector<16x1xf32>
    %cst_103 = arith.constant 3.200000e+01 : f32
    %319 = vector.broadcast %cst_103 : f32 to vector<16x1xf32>
    %320 = arith.divf %318, %319 : vector<16x1xf32>
    %321 = vector.broadcast %320 : vector<16x1xf32> to vector<16x32xf32>
    %322 = arith.subf %314, %321 : vector<16x32xf32>
    %323 = arith.mulf %322, %322 : vector<16x32xf32>
    %cst_104 = arith.constant dense<0.000000e+00> : vector<16xf32>
    %324 = vector.multi_reduction <add>, %323, %cst_104 [1] : vector<16x32xf32> to vector<16xf32>
    %325 = vector.shape_cast %324 : vector<16xf32> to vector<16x1xf32>
    %cst_105 = arith.constant 3.200000e+01 : f32
    %326 = vector.broadcast %cst_105 : f32 to vector<16x1xf32>
    %327 = arith.divf %325, %326 : vector<16x1xf32>
    %cst_106 = arith.constant 9.99999974E-6 : f32
    %328 = vector.broadcast %cst_106 : f32 to vector<16x1xf32>
    %329 = arith.addf %327, %328 : vector<16x1xf32>
    %330 = math.rsqrt %329 : vector<16x1xf32>
    %331 = vector.broadcast %330 : vector<16x1xf32> to vector<16x32xf32>
    %332 = arith.mulf %322, %331 : vector<16x32xf32>
    %333 = vector.broadcast %315 : vector<1x32xf32> to vector<16x32xf32>
    %334 = arith.mulf %332, %333 : vector<16x32xf32>
    %335 = vector.broadcast %316 : vector<1x32xf32> to vector<16x32xf32>
    %336 = arith.addf %334, %335 : vector<16x32xf32>
    %337 = vector.shape_cast %336 : vector<16x32xf32> to vector<2x8x32xf32>
    %cst_107 = arith.constant dense<0.000000e+00> : vector<2x32xf32>
    %338 = vector.multi_reduction <add>, %337, %cst_107 [1] : vector<2x8x32xf32> to vector<2x32xf32>
    %cst_108 = arith.constant 1.250000e-01 : f32
    %339 = vector.broadcast %cst_108 : f32 to vector<2x32xf32>
    %340 = arith.mulf %338, %339 : vector<2x32xf32>
    %c0_109 = arith.constant 0 : index
    %c0_110 = arith.constant 0 : index
    %341 = vector.load %arg17[%c0_109, %c0_110] : memref<32x128xf32, #tpu.memory_space<vmem>>, vector<32x128xf32>
    %cst_111 = arith.constant dense<0.000000e+00> : vector<2x128xf32>
    %342 = tpu.matmul %340, %341, %cst_111 {dimension_numbers = #tpu.dot_dimension_numbers<[1], [0], [0], [1], [0, 0, 1, 1], [], []>} : vector<2x32xf32>, vector<32x128xf32>, vector<2x128xf32> -> vector<2x128xf32>
    %c0_112 = arith.constant 0 : index
    %c0_113 = arith.constant 0 : index
    %343 = vector.load %arg18[%c0_112, %c0_113] : memref<1x128xf32, #tpu.memory_space<vmem>>, vector<1x128xf32>
    %344 = vector.broadcast %343 : vector<1x128xf32> to vector<2x128xf32>
    %345 = arith.addf %342, %344 : vector<2x128xf32>
    %c0_114 = arith.constant 0 : index
    %c0_115 = arith.constant 0 : index
    %346 = vector.load %arg19[%c0_114, %c0_115] : memref<2x128xf32, #tpu.memory_space<vmem>>, vector<2x128xf32>
    tpu.vector_store %arg19[%c0_114, %c0_115], %345 {strides = array<i32>} : memref<2x128xf32, #tpu.memory_space<vmem>>, vector<2x128xf32>,
    return
  }
  func.func @transform_0(%arg0: i32) -> (i32, i32, i32) {
    %c0_i32 = arith.constant 0 : i32
    %c0_i32_0 = arith.constant 0 : i32
    %c0_i32_1 = arith.constant 0 : i32
    return %arg0, %c0_i32, %c0_i32_0 : i32, i32, i32
  }
  func.func @transform_1(%arg0: i32) -> (i32, i32) {
    %c0_i32 = arith.constant 0 : i32
    %c0_i32_0 = arith.constant 0 : i32
    %c0_i32_1 = arith.constant 0 : i32
    return %c0_i32, %c0_i32_0 : i32, i32
  }
  func.func @transform_2(%arg0: i32) -> (i32, i32) {
    %c0_i32 = arith.constant 0 : i32
    %c0_i32_0 = arith.constant 0 : i32
    %c0_i32_1 = arith.constant 0 : i32
    return %c0_i32, %c0_i32_0 : i32, i32
  }
  func.func @transform_3(%arg0: i32) -> (i32, i32) {
    %c0_i32 = arith.constant 0 : i32
    %c0_i32_0 = arith.constant 0 : i32
    %c0_i32_1 = arith.constant 0 : i32
    return %c0_i32, %c0_i32_0 : i32, i32
  }
  func.func @transform_4(%arg0: i32) -> (i32, i32, i32) {
    %c0_i32 = arith.constant 0 : i32
    %c0_i32_0 = arith.constant 0 : i32
    %c0_i32_1 = arith.constant 0 : i32
    %c0_i32_2 = arith.constant 0 : i32
    return %c0_i32, %c0_i32_0, %c0_i32_1 : i32, i32, i32
  }
  func.func @transform_5(%arg0: i32) -> (i32, i32, i32) {
    %c0_i32 = arith.constant 0 : i32
    %c0_i32_0 = arith.constant 0 : i32
    %c0_i32_1 = arith.constant 0 : i32
    %c0_i32_2 = arith.constant 0 : i32
    return %c0_i32, %c0_i32_0, %c0_i32_1 : i32, i32, i32
  }
  func.func @transform_6(%arg0: i32) -> (i32, i32, i32) {
    %c0_i32 = arith.constant 0 : i32
    %c0_i32_0 = arith.constant 0 : i32
    %c0_i32_1 = arith.constant 0 : i32
    %c0_i32_2 = arith.constant 0 : i32
    return %c0_i32, %c0_i32_0, %c0_i32_1 : i32, i32, i32
  }
  func.func @transform_7(%arg0: i32) -> (i32, i32) {
    %c0_i32 = arith.constant 0 : i32
    %c0_i32_0 = arith.constant 0 : i32
    %c0_i32_1 = arith.constant 0 : i32
    return %c0_i32, %c0_i32_0 : i32, i32
  }
  func.func @transform_8(%arg0: i32) -> (i32, i32) {
    %c0_i32 = arith.constant 0 : i32
    %c0_i32_0 = arith.constant 0 : i32
    %c0_i32_1 = arith.constant 0 : i32
    return %c0_i32, %c0_i32_0 : i32, i32
  }
  func.func @transform_9(%arg0: i32) -> (i32, i32) {
    %c0_i32 = arith.constant 0 : i32
    %c0_i32_0 = arith.constant 0 : i32
    %c0_i32_1 = arith.constant 0 : i32
    return %c0_i32, %c0_i32_0 : i32, i32
  }
  func.func @transform_10(%arg0: i32) -> (i32, i32) {
    %c0_i32 = arith.constant 0 : i32
    %c0_i32_0 = arith.constant 0 : i32
    %c0_i32_1 = arith.constant 0 : i32
    return %c0_i32, %c0_i32_0 : i32, i32
  }
  func.func @transform_11(%arg0: i32) -> (i32, i32) {
    %c0_i32 = arith.constant 0 : i32
    %c0_i32_0 = arith.constant 0 : i32
    %c0_i32_1 = arith.constant 0 : i32
    return %c0_i32, %c0_i32_0 : i32, i32
  }
  func.func @transform_12(%arg0: i32) -> (i32, i32, i32) {
    %c0_i32 = arith.constant 0 : i32
    %c0_i32_0 = arith.constant 0 : i32
    %c0_i32_1 = arith.constant 0 : i32
    %c0_i32_2 = arith.constant 0 : i32
    return %c0_i32, %c0_i32_0, %c0_i32_1 : i32, i32, i32
  }
  func.func @transform_13(%arg0: i32) -> (i32, i32) {
    %c0_i32 = arith.constant 0 : i32
    %c0_i32_0 = arith.constant 0 : i32
    %c0_i32_1 = arith.constant 0 : i32
    return %c0_i32, %c0_i32_0 : i32, i32
  }
  func.func @transform_14(%arg0: i32) -> (i32, i32, i32) {
    %c0_i32 = arith.constant 0 : i32
    %c0_i32_0 = arith.constant 0 : i32
    %c0_i32_1 = arith.constant 0 : i32
    %c0_i32_2 = arith.constant 0 : i32
    return %c0_i32, %c0_i32_0, %c0_i32_1 : i32, i32, i32
  }
  func.func @transform_15(%arg0: i32) -> (i32, i32) {
    %c0_i32 = arith.constant 0 : i32
    %c0_i32_0 = arith.constant 0 : i32
    %c0_i32_1 = arith.constant 0 : i32
    return %c0_i32, %c0_i32_0 : i32, i32
  }
  func.func @transform_16(%arg0: i32) -> (i32, i32) {
    %c0_i32 = arith.constant 0 : i32
    %c0_i32_0 = arith.constant 0 : i32
    %c0_i32_1 = arith.constant 0 : i32
    return %c0_i32, %c0_i32_0 : i32, i32
  }
  func.func @transform_17(%arg0: i32) -> (i32, i32) {
    %c0_i32 = arith.constant 0 : i32
    %c0_i32_0 = arith.constant 0 : i32
    %c0_i32_1 = arith.constant 0 : i32
    return %c0_i32, %c0_i32_0 : i32, i32
  }
  func.func @transform_18(%arg0: i32) -> (i32, i32) {
    %c0_i32 = arith.constant 0 : i32
    %c0_i32_0 = arith.constant 0 : i32
    return %arg0, %c0_i32 : i32, i32
  }
}

</mosaic_0001>

<bundles_post_ra>
// kernel: tpu_custom_call.1
= control target key start
LH: loop header
LB: loop body
LE: loop exit
PB: predicated region body
PF: predicated region fallthrough
CT: control target
= control target key end

     0   :  { %s2926_s0 = inlined_call_operand.hbm [shape: f32[2,8,32], index: 0, kind: input, shape index: {}]   ;;  %s2927_s1 = inlined_call_operand.hbm [shape: f32[16,32], index: 1, kind: input, shape index: {}]   ;;  %s2928_s2 = inlined_call_operand.hbm [shape: f32[32,32], index: 2, kind: input, shape index: {}]   ;;  %s2929_s3 = inlined_call_operand.hbm [shape: f32[1,32], index: 3, kind: input, shape index: {}]   ;;  %s2930_s4 = inlined_call_operand.vmem [shape: f32[2,32,96], index: 4, kind: input, shape index: {}]   ;;  %s2931_s5 = inlined_call_operand.vmem [shape: f32[2,1,96], index: 5, kind: input, shape index: {}]   ;;  %s2932_s6 = inlined_call_operand.vmem [shape: f32[2,32,32], index: 6, kind: input, shape index: {}]   ;;  %s2933_s7 = inlined_call_operand.vmem [shape: f32[2,32], index: 7, kind: input, shape index: {}]   ;;  %s2934_s8 = inlined_call_operand.hbm [shape: f32[2,32], index: 8, kind: input, shape index: {}]   ;;  %s2935_s9 = inlined_call_operand.vmem [shape: f32[2,32], index: 9, kind: input, shape index: {}]   ;;  %s2936_s10 = inlined_call_operand.vmem [shape: f32[2,32], index: 10, kind: input, shape index: {}]   ;;  %s2937_s11 = inlined_call_operand.hbm [shape: f32[2,32], index: 11, kind: input, shape index: {}]   ;;  %s2938_s12 = inlined_call_operand.vmem [shape: f32[2,32,64], index: 12, kind: input, shape index: {}]   ;;  %s2939_s13 = inlined_call_operand.vmem [shape: f32[2,64], index: 13, kind: input, shape index: {}]   ;;  %s2940_s14 = inlined_call_operand.vmem [shape: f32[2,64,32], index: 14, kind: input, shape index: {}]   ;;  %s2941_s15 = inlined_call_operand.vmem [shape: f32[2,32], index: 15, kind: input, shape index: {}]   ;;  %s2942_s16 = inlined_call_operand.hbm [shape: f32[32,128], index: 16, kind: input, shape index: {}]   ;;  %s2943_s17 = inlined_call_operand.vmem [shape: f32[1,128], index: 17, kind: input, shape index: {}]   ;;  %s2944_s18 = inlined_call_operand.hbm [shape: f32[2,128], index: 18, kind: output, shape index: {}]  }
   0x1   :  { %2952 = sst [smem:[#allocation20_spill]] %s2926_s0 }
   0x2   :  { %2953 = sst [smem:[#allocation21_spill]] %s2927_s1 }
   0x3   :  { %2954 = sst [smem:[#allocation22_spill]] %s2928_s2 }
   0x4   :  { %2955 = sst [smem:[#allocation23_spill]] %s2944_s18 }
   0x5   :  { %23 = vsyncpa [#allocation3], 0 }
   0x6   :  { %24 = vsyncpa [#allocation6], 0 }
   0x7   :  { %25 = vsyncpa [#allocation9], 0 }
   0x8   :  { %26 = vsyncpa [#allocation12], 0 }
   0x9   :  { %27 = vsyncpa [#allocation4], 0  ;;  %s2956_s29 = sld [smem:[#allocation21_spill]]  ;;  %s2310_s0 = smov [#allocation5]  }
   0xa   :  { %s47_s19 = sshll.u32 %s2310_s0, 4  ;;  %s72_s21 = sshll.u32 %s2929_s3, 4  ;;  %s48_s19 = int_to_ptr.vmem [resolvable:$true] %s47_s19  ;;  %s73_s21 = int_to_ptr.hbm [resolvable:$true] %s72_s21 }
   0xb   :  { %s2945_s22 = smov 128   ;;  %s2947_s2 = smov 8  }
   0xc   :  { %s2313_s23 = smov [#allocation8]   ;;  %s106_s27 = sshll.u32 %s2937_s11, 4  ;;  %s107_s27 = int_to_ptr.hbm [resolvable:$true] %s106_s27 }
   0xd   :  { %s74_s24 = sshll.u32 %s2313_s23, 4  ;;  %s2957_s0 = sld [smem:[#allocation20_spill]]  ;;  %s75_s24 = int_to_ptr.vmem [resolvable:$true] %s74_s24 }
   0xe   :  { %77 = dma.hbm_to_vmem [thread:$0]  %s73_s21, 16, %s75_s24, [#allocation9]  }
   0xf   :  { %s45_s30 = sshll.u32 %s2956_s29, 4  ;;  %s2314_s1 = smov [#allocation11]   ;;  %s46_s30 = int_to_ptr.hbm [resolvable:$true] %s45_s30 }
  0x10   :  { %53 = dma.hbm_to_vmem [thread:$0]  %s46_s30, 256, %s48_s19, [#allocation6], %s2945_s22, %s2945_s22, %s2947_s2  }
  0x11   :  { %s108_s20 = sshll.u32 %s2314_s1, 4  ;;  %s2315_s30 = smov [#allocation2]   ;;  %s109_s20 = int_to_ptr.vmem [resolvable:$true] %s108_s20 }
  0x12   :  { %111 = dma.hbm_to_vmem [thread:$0]  %s107_s27, 32, %s109_s20, [#allocation12]  }
  0x13   :  { %s32_s3 = sshll.u32 %s2957_s0, 4  ;;  %s34_s19 = sshll.u32 %s2315_s30, 4  ;;  %s33_s3 = int_to_ptr.hbm [resolvable:$true] %s32_s3  ;;  %s35_s19 = int_to_ptr.vmem [resolvable:$true] %s34_s19 }
  0x14   :  { %s2958_s2 = sld [smem:[#allocation22_spill]]  ;;  %s2959_s11 = smov 8  }
  0x15   :  { %s2960_s25 = smov 128   ;;  %s91_s26 = sshll.u32 %s2934_s8, 4  ;;  %s92_s26 = int_to_ptr.hbm [resolvable:$true] %s91_s26 }
  0x16   :  { %40 = dma.hbm_to_vmem [thread:$0]  %s33_s3, 256, %s35_s19, [#allocation3], %s2960_s25, %s2960_s25, %s2959_s11  }
  0x17   :  { %s2316_s28 = smov [#allocation7]   ;;  %s2317_s22 = smov [#allocation10]  }
  0x18   :  { %s60_s29 = sshll.u32 %s2316_s28, 4  ;;  %s124_s1 = sshll.u32 %s2942_s16, 4  ;;  %s61_s29 = int_to_ptr.vmem [resolvable:$true] %s60_s29  ;;  %s125_s1 = int_to_ptr.hbm [resolvable:$true] %s124_s1 }
  0x19   :  { %s2318_s3 = smov [#allocation13]  }
  0x1a   :  { %s58_s18 = sshll.u32 %s2958_s2, 4  ;;  %s93_s2 = sshll.u32 %s2317_s22, 4  ;;  %s59_s18 = int_to_ptr.hbm [resolvable:$true] %s58_s18  ;;  %s94_s2 = int_to_ptr.vmem [resolvable:$true] %s93_s2 }
  0x1b   :  { %66 = dma.hbm_to_vmem [thread:$0]  %s59_s18, 512, %s61_s29, [#allocation6], %s2960_s25, %s2960_s25, %s2959_s11  }
  0x1c   :  { %96 = dma.hbm_to_vmem [thread:$0]  %s92_s26, 32, %s94_s2, [#allocation9]  }
  0x1d   :  { %s126_s20 = sshll.u32 %s2318_s3, 4  ;;  %s127_s20 = int_to_ptr.vmem [resolvable:$true] %s126_s20 }
  0x1e   :  { %132 = dma.hbm_to_vmem [thread:$0]  %s125_s1, 512, %s127_s20, [#allocation12], %s2960_s25, %s2960_s25, %s2959_s11  }
  0x1f   :  { %2300 = dma.done.wait [#allocation3], 256  }
  0x20   :  { %2301 = vsyncadd [#allocation3], 4294967040 }
  0x21   :  { %2302 = dma.done.wait [#allocation6], 768  }
  0x22   :  { %2303 = vsyncadd [#allocation6], 4294966528 }
  0x23   :  { %2304 = dma.done.wait [#allocation9], 48  }
  0x24   :  { %2305 = vsyncadd [#allocation9], 4294967248 }
  0x25   :  { %2306 = dma.done.wait [#allocation12], 544  }
  0x26   :  { %2307 = vsyncadd [#allocation12], 4294966752  ;;  %v168_v0 = vld [vmem:[#allocation7 + $0x18] sm:$0xff]  ;;  %v167_v1 = vld [vmem:[#allocation7 + $0x10] sm:$0xff]  ;;  %vm173_vm0 = vcmask 261120   ;;  %s2319_s28 = smov 96  }
  0x27   :  { %192 = vmatpush.msra.mxu0 %v168_v0  ;;  %v166_v2 = vld [vmem:[#allocation7 + $0x8] sm:$0xff]  ;;  %v210_v3 = vld [vmem:[%s2930_s4 + $0x18] sm:$0xff]  ;;  %v165_v4 = vld [vmem:[#allocation7] sm:$0xff]  ;;  %s2320_s29 = smov 64   ;;  %s2321_s22 = smov 88   ;;  %vm291_vm1 = vcmask 64512  }
  0x28   :  { %277 = vmatpush.msra.mxu1 %v210_v3  ;;  %v163_v5 = vld [vmem:[#allocation2] sm:$0xff]  ;;  %v164_v6 = vld [vmem:[#allocation2 + $0x8] sm:$0xff]  ;;  %v209_v7 = vld [vmem:[%s2930_s4 + $0x10] sm:$0xff]  ;;  %s2322_s2 = smov 120   ;;  %s2323_s27 = smov 112   ;;  %vm841_vm2 = vcmask 130048  }
  0x29   :  { %193 = vmatpush.msra.mxu0 %v167_v1  ;;  %v208_v8 = vld [vmem:[%s2930_s4 + $0x8] sm:$0xff]  ;;  %v207_v9 = vld [vmem:[%s2930_s4] sm:$0xff]  ;;  %v203_v12 = vld [vmem:[#allocation5] sm:$0xff]  ;;  %s2324_s0 = smov 80   ;;  %s2325_s1 = smov 104   ;;  %vm844_vm3 = vcmask 195584  }
  0x2a   :  { %278 = vmatpush.msra.mxu1 %v209_v7  ;;  %v2022_v10 = vld [vmem:[#allocation8] ss:$0 sm:$0xff]  ;;  %v204_v16 = vld [vmem:[#allocation5 + $0x8] sm:$0xff]  ;;  %s2326_s3 = smov 56   ;;  %s2327_s20 = smov 72   ;;  %vm969_vm11 = vcmask 523264  }
  0x2b   :  { %194 = vmatpush.msra.mxu0 %v166_v2  ;;  %v2023_v19 = vld [vmem:[%s2931_s5] ss:$0 sm:$0xff]  ;;  %s2949_s8 = smov 40   ;;  %s2329_s16 = smov 48  }
  0x2c   :  { %279 = vmatpush.msra.mxu1 %v208_v8  ;;  %s2950_s18 = smov 16   ;;  %s2331_s30 = smov 24  }
  0x2d   :  { %195 = vmatpush.msra.mxu0 %v165_v4 }
  0x2e   :  { %1906 = vmatmul.msk.f32.vlgmr.msra.gmra.mxu0 %vm173_vm0, %v163_v5  ;;  %280 = vmatpush.msra.mxu1 %v207_v9 }
  0x36   :  { %1907 = vmatmul.msk.f32.gmra.mxu0 %vm173_vm0, %v164_v6 }
  0xab   :  { %v197_v11 = vpop.f32.mrf.mxu0 }
  0xac   :  { %v198_v13 = vadd.f32 %v2022_v10, %v197_v11 }
  0xae   :  { %v2476_v14 = vadd.f32 %v203_v12, %v198_v13 }
  0xb0   :  { %1908 = vmatmul.msk.f32.vlgmr.msra.gmra.mxu1 %vm173_vm0, %v2476_v14 }
  0xb3   :  { %v200_v15 = vpop.f32.mrf.mxu0 }
  0xb4   :  { %v201_v17 = vadd.f32 %v2022_v10, %v200_v15 }
  0xb6   :  { %v2480_v18 = vadd.f32 %v204_v16, %v201_v17 }
  0xb8   :  { %1909 = vmatmul.msk.f32.gmra.mxu1 %vm173_vm0, %v2480_v18 }
 0x12d   :  { %v282_v20 = vpop.f32.mrf.mxu1 }
 0x12e   :  { %v2487_v21 = vadd.f32 %v2023_v19, %v282_v20 }
 0x130   :  { %289 = vrot.lane.b32.xlu1 %v2487_v21, %s2319_s28 }
 0x135   :  { %v285_v22 = vpop.f32.mrf.mxu1 }
 0x136   :  { %v2491_v23 = vadd.f32 %v2023_v19, %v285_v22 }
 0x138   :  { %393 = vrot.lane.b32.xlu2 %v2491_v23, %s2320_s29  ;;  %317 = vrot.lane.b32.xlu0 %v2491_v23, %s2319_s28 }
 0x140   :  { %449 = vrot.lane.b32.xlu2 %v2491_v23, %s2321_s22 }
 0x148   :  { %447 = vrot.lane.b32.xlu2 %v2491_v23, %s2322_s2 }
 0x192   :  { %v394_v25 = vpop.permute.xlu2 %393 }
 0x19a   :  { %v450_v27 = vpop.permute.xlu2 %449 }
 0x1a2   :  { %v290_v24 = vpop.permute.xlu1 %289  ;;  %v448_v34 = vpop.permute.xlu2 %447 }
 0x1a3   :  { %1910 = vmatpush.xpose.msk.msra.mxu2 %vm291_vm1, %v290_v24 }
 0x1a6   :  { %1911 = vmatmul.msk.f32.vlgmr.msra.gmra.mxu2 %vm291_vm1, %v2487_v21 }
 0x1aa   :  { %v318_v26 = vpop.permute.xlu0 %317 }
 0x1ab   :  { %1912 = vmatpush.xpose.msk.msra.mxu3 %vm291_vm1, %v318_v26 }
 0x1ae   :  { %1913 = vmatmul.msk.f32.vlgmr.msra.gmra.mxu3 %vm291_vm1, %v2491_v23 }
 0x1af   :  { %414 = vmatpush.msrb.mxu3 %v394_v25 }
 0x1b1   :  { %1918 = vmatpush.xpose.msk.msra.mxu3 %vm291_vm1, %v450_v27 }
 0x229   :  { %v313_v28 = vpop.f32.mrf.mxu2 }
 0x22a   :  { %v343_v29 = vmul.f32 0.35355338, %v313_v28 }
 0x22c   :  { %v345_v30 = vsel %vm291_vm1, %v343_v29, -inf }
 0x22d   :  { %346 = vmax.xlane.f32.xlu2 %v345_v30 }
 0x231   :  { %v340_v31 = vpop.f32.mrf.mxu3 }
 0x232   :  { %v344_v32 = vmul.f32 0.35355338, %v340_v31 }
 0x234   :  { %v348_v33 = vsel %vm291_vm1, %v344_v32, -inf }
 0x235   :  { %349 = vmax.xlane.f32.xlu0 %v348_v33 }
 0x245   :  { %419 = vrot.lane.b32.xlu2 %v2487_v21, %s2322_s2 }
 0x24d   :  { %579 = vrot.lane.b32.xlu2 %v2491_v23, %s2323_s27 }
 0x2a0   :  { %v347_v35 = vpop.xlane.xlu2 %346 }
 0x2a1   :  { %v351_v38 = vsub.f32 %v343_v29, %v347_v35 }
 0x2a3   :  { %v353_v40 = vmul.f32 1.442695, %v351_v38 }
 0x2a8   :  { %v350_v36 = vpop.xlane.xlu0 %349  ;;  %v420_v51 = vpop.permute.xlu2 %419 }
 0x2a9   :  { %v352_v37 = vsub.f32 %v344_v32, %v350_v36 }
 0x2ab   :  { %v355_v39 = vmul.f32 1.442695, %v352_v37 }
 0x2ad   :  { %2026 = vpow2.f32 %v355_v39 }
 0x2ae   :  { %2028 = vpow2.f32 %v353_v40 }
 0x2b0   :  { %v580_v53 = vpop.permute.xlu2 %579 }
 0x2b3   :  { %v2027_v41 = vpop.eup %2026 }
 0x2b4   :  { %v360_v42 = vsel %vm291_vm1, %v2027_v41, 0.0  ;;  %v2029_v43 = vpop.eup %2028 }
 0x2b5   :  { %361 = vadd.xlane.f32.xlu1 %v360_v42  ;;  %v357_v44 = vsel %vm291_vm1, %v2029_v43, 0.0  ;;  %v1997_v42 = vpack.i.bf16 %v2491_v23, %v2487_v21 }
 0x2bd   :  { %358 = vadd.xlane.f32.xlu1 %v357_v44 }
 0x2d6   :  { %421 = vrot.lane.b32.xlu1 %v2487_v21, %s2321_s22 }
 0x2de   :  { %553 = vrot.lane.b32.xlu1 %v2487_v21, %s2324_s0 }
 0x2e6   :  { %581 = vrot.lane.b32.xlu1 %v2491_v23, %s2324_s0 }
 0x2ee   :  { %683 = vrot.lane.b32.xlu1 %v2487_v21, %s2325_s1 }
 0x328   :  { %v362_v45 = vpop.xlane.xlu1 %361 }
 0x329   :  { %2030 = vrcp.f32 %v362_v45 }
 0x32f   :  { %v2031_v46 = vpop.eup %2030 }
 0x330   :  { %v366_v47 = vmul.f32 %v2031_v46, %v2027_v41  ;;  %v359_v48 = vpop.xlane.xlu1 %358 }
 0x332   :  { %1915 = vmatmul.msk.f32.vlgmr.msrb.gmra.mxu3 %vm291_vm1, %v366_v47 }
 0x33a   :  { %1919 = vmatmul.msk.f32.vlgmr.msra.gmra.mxu3 %vm291_vm1, %v448_v34 }
 0x348   :  { %v422_v49 = vpop.permute.xlu1 %421 }
 0x350   :  { %v554_v50 = vpop.permute.xlu1 %553 }
 0x358   :  { %v582_v52 = vpop.permute.xlu1 %581 }
 0x359   :  { %1924 = vmatpush.xpose.msk.msrb.mxu3 %vm291_vm1, %v582_v52 }
 0x35c   :  { %1925 = vmatmul.msk.f32.vlgmr.msrb.gmra.mxu3 %vm291_vm1, %v580_v53 }
 0x360   :  { %v684_v15 = vpop.permute.xlu1 %683 }
 0x3b5   :  { %v2528_v54 = vpop.f32.mrf.mxu3 }
 0x3bd   :  { %v472_v55 = vpop.f32.mrf.mxu3 }
 0x3be   :  { %v476_v56 = vmul.f32 0.35355338, %v472_v55 }
 0x3c0   :  { %v480_v57 = vsel %vm291_vm1, %v476_v56, -inf }
 0x3c1   :  { %481 = vmax.xlane.f32.xlu0 %v480_v57 }
 0x3d5   :  { %367 = vrot.lane.b32.xlu0 %v2487_v21, %s2320_s29 }
 0x3dd   :  { %525 = vrot.lane.b32.xlu0 %v2491_v23, %s2326_s3 }
 0x3df   :  { %v604_v6 = vpop.f32.mrf.mxu3 }
 0x3e0   :  { %v608_v7 = vmul.f32 0.35355338, %v604_v6 }
 0x3e2   :  { %v612_v8 = vsel %vm291_vm1, %v608_v7, -inf }
 0x3e5   :  { %551 = vrot.lane.b32.xlu0 %v2487_v21, %s2323_s27 }
 0x3ed   :  { %685 = vrot.lane.b32.xlu0 %v2487_v21, %s2327_s20 }
 0x3f5   :  { %713 = vrot.lane.b32.xlu0 %v2491_v23, %s2327_s20 }
 0x434   :  { %v482_v58 = vpop.xlane.xlu0 %481 }
 0x435   :  { %v484_v59 = vsub.f32 %v476_v56, %v482_v58 }
 0x437   :  { %v487_v60 = vmul.f32 1.442695, %v484_v59 }
 0x439   :  { %2032 = vpow2.f32 %v487_v60 }
 0x43a   :  { %2034 = vrcp.f32 %v359_v48 }
 0x43f   :  { %v2033_v61 = vpop.eup %2032 }
 0x440   :  { %v492_v62 = vsel %vm291_vm1, %v2033_v61, 0.0  ;;  %v2035_v63 = vpop.eup %2034 }
 0x441   :  { %493 = vadd.xlane.f32.xlu2 %v492_v62  ;;  %v365_v1 = vmul.f32 %v2035_v63, %v2029_v43 }
 0x447   :  { %v368_v0 = vpop.permute.xlu0 %367 }
 0x448   :  { %388 = vmatpush.msrb.mxu2 %v368_v0 }
 0x449   :  { %1914 = vmatmul.msk.f32.vlgmr.msrb.gmra.mxu2 %vm291_vm1, %v365_v1 }
 0x44a   :  { %1916 = vmatpush.xpose.msk.msra.mxu2 %vm291_vm1, %v422_v49 }
 0x44f   :  { %v526_v2 = vpop.permute.xlu0 %525 }
 0x450   :  { %546 = vmatpush.msrb.mxu2 %v526_v2 }
 0x451   :  { %1917 = vmatmul.msk.f32.vlgmr.msra.gmra.mxu2 %vm291_vm1, %v420_v51 }
 0x452   :  { %1922 = vmatpush.xpose.msk.msra.mxu2 %vm291_vm1, %v554_v50 }
 0x457   :  { %v552_v3 = vpop.permute.xlu0 %551 }
 0x459   :  { %711 = vrot.lane.b32.xlu2 %v2491_v23, %s2325_s1 }
 0x45f   :  { %v686_v4 = vpop.permute.xlu0 %685 }
 0x467   :  { %v714_v5 = vpop.permute.xlu0 %713 }
 0x468   :  { %1930 = vmatpush.xpose.msk.msra.mxu3 %vm291_vm1, %v714_v5 }
 0x482   :  { %613 = vmax.xlane.f32.xlu2 %v612_v8 }
 0x4b4   :  { %v494_v9 = vpop.xlane.xlu2 %493 }
 0x4b5   :  { %2036 = vrcp.f32 %v494_v9 }
 0x4bb   :  { %v2037_v10 = vpop.eup %2036 }
 0x4bc   :  { %v498_v11 = vmul.f32 %v2037_v10, %v2033_v61  ;;  %v712_v12 = vpop.permute.xlu2 %711 }
 0x4bd   :  { %1931 = vmatmul.msk.f32.vlgmr.msra.gmra.mxu3 %vm291_vm1, %v712_v12 }
 0x4be   :  { %1921 = vmatmul.msk.f32.vlgmr.msrb.gmra.mxu2 %vm291_vm1, %v498_v11 }
 0x4bf   :  { %1928 = vmatpush.xpose.msk.msrb.mxu2 %vm291_vm1, %v686_v4 }
 0x4c6   :  { %1923 = vmatmul.msk.f32.vlgmr.msra.gmra.mxu2 %vm291_vm1, %v552_v3 }
 0x4cc   :  { %v2554_v13 = vpop.f32.mrf.mxu2 }
 0x4ce   :  { %1929 = vmatmul.msk.f32.vlgmr.msrb.gmra.mxu2 %vm291_vm1, %v684_v15 }
 0x4d4   :  { %v444_v16 = vpop.f32.mrf.mxu2 }
 0x4d5   :  { %v475_v17 = vmul.f32 0.35355338, %v444_v16 }
 0x4d7   :  { %v477_v19 = vsel %vm291_vm1, %v475_v17, -inf }
 0x4d8   :  { %478 = vmax.xlane.f32.xlu1 %v477_v19 }
 0x4f5   :  { %v614_v25 = vpop.xlane.xlu2 %613 }
 0x4f6   :  { %v616_v30 = vsub.f32 %v608_v7, %v614_v25  ;;  %v220_v25 = vld [vmem:[%s2932_s6 + $0x18] sm:$0xff] }
 0x4f7   :  { %866 = vmatpush.msra.mxu2 %v220_v25 }
 0x4f8   :  { %v619_v34 = vmul.f32 1.442695, %v616_v30 }
 0x540   :  { %v736_v29 = vpop.f32.mrf.mxu3 }
 0x541   :  { %v2558_v20 = vpop.f32.mrf.mxu2  ;;  %v740_v32 = vmul.f32 0.35355338, %v736_v29 }
 0x543   :  { %v744_v36 = vsel %vm291_vm1, %v740_v32, -inf }
 0x549   :  { %v576_v22 = vpop.f32.mrf.mxu2 }
 0x54a   :  { %v607_v24 = vmul.f32 0.35355338, %v576_v22 }
 0x54b   :  { %v479_v26 = vpop.xlane.xlu1 %478 }
 0x54c   :  { %v483_v27 = vsub.f32 %v475_v17, %v479_v26  ;;  %v609_v28 = vsel %vm291_vm1, %v607_v24, -inf  ;;  %v219_v26 = vld [vmem:[%s2932_s6 + $0x10] sm:$0xff] }
 0x54d   :  { %610 = vmax.xlane.f32.xlu0 %v609_v28  ;;  %867 = vmatpush.msra.mxu2 %v219_v26  ;;  %v2661_v26 = vld [vmem:[%s2935_s9] sm:$0x3] }
 0x54e   :  { %v485_v31 = vmul.f32 1.442695, %v483_v27  ;;  %v217_v27 = vld [vmem:[%s2932_s6] sm:$0xff] }
 0x550   :  { %2038 = vpow2.f32 %v485_v31 }
 0x551   :  { %v708_v33 = vpop.f32.mrf.mxu2  ;;  %2040 = vpow2.f32 %v619_v34 }
 0x552   :  { %v739_v35 = vmul.f32 0.35355338, %v708_v33 }
 0x554   :  { %v741_v37 = vsel %vm291_vm1, %v739_v35, -inf }
 0x555   :  { %745 = vmax.xlane.f32.xlu0 %v744_v36  ;;  %742 = vmax.xlane.f32.xlu1 %v741_v37 }
 0x556   :  { %v2039_v38 = vpop.eup %2038 }
 0x557   :  { %v489_v39 = vsel %vm291_vm1, %v2039_v38, 0.0  ;;  %v2041_v40 = vpop.eup %2040 }
 0x558   :  { %490 = vadd.xlane.f32.xlu2 %v489_v39  ;;  %v624_v41 = vsel %vm291_vm1, %v2041_v40, 0.0 }
 0x560   :  { %625 = vadd.xlane.f32.xlu2 %v624_v41 }
 0x569   :  { %499 = vrot.lane.b32.xlu0 %v2487_v21, %s2326_s3 }
 0x571   :  { %763 = vrot.lane.b32.xlu0 %v2487_v21, %s2949_s8 }
 0x578   :  { %1998 = vrot.lane.b32.xlu2 %v1997_v42, %s2329_s16 }
 0x5c0   :  { %v611_v43 = vpop.xlane.xlu0 %610 }
 0x5c1   :  { %v615_v46 = vsub.f32 %v607_v24, %v611_v43 }
 0x5c3   :  { %v617_v49 = vmul.f32 1.442695, %v615_v46 }
 0x5c8   :  { %v746_v44 = vpop.xlane.xlu0 %745  ;;  %v743_v50 = vpop.xlane.xlu1 %742 }
 0x5c9   :  { %v748_v45 = vsub.f32 %v740_v32, %v746_v44  ;;  %v747_v52 = vsub.f32 %v739_v35, %v743_v50 }
 0x5cb   :  { %v751_v47 = vmul.f32 1.442695, %v748_v45  ;;  %v491_v48 = vpop.xlane.xlu2 %490  ;;  %v749_v55 = vmul.f32 1.442695, %v747_v52 }
 0x5cd   :  { %2042 = vpow2.f32 %v751_v47 }
 0x5ce   :  { %2044 = vrcp.f32 %v491_v48  ;;  %v2332_v48 = vmov 32.0  }
 0x5cf   :  { %2046 = vpow2.f32 %v617_v49 }
 0x5d3   :  { %v2043_v51 = vpop.eup %2042  ;;  %v626_v53 = vpop.xlane.xlu2 %625 }
 0x5d4   :  { %2048 = vrcp.f32 %v626_v53  ;;  %v756_v21 = vsel %vm291_vm1, %v2043_v51, 0.0  ;;  %v2045_v56 = vpop.eup %2044 }
 0x5d5   :  { %757 = vadd.xlane.f32.xlu1 %v756_v21  ;;  %v2047_v57 = vpop.eup %2046  ;;  %2050 = vpow2.f32 %v749_v55  ;;  %v497_v61 = vmul.f32 %v2045_v56, %v2039_v38 }
 0x5d6   :  { %v621_v63 = vsel %vm291_vm1, %v2047_v57, 0.0 }
 0x5da   :  { %v2049_v58 = vpop.eup %2048 }
 0x5db   :  { %v500_v59 = vpop.permute.xlu0 %499  ;;  %v1999_v60 = vpop.permute.xlu2 %1998  ;;  %v630_v1 = vmul.f32 %v2049_v58, %v2041_v40 }
 0x5dc   :  { %v2000_v62 = vunpack.i.l.bf16 %v1999_v60  ;;  %520 = vmatpush.msrb.mxu0 %v500_v59  ;;  %v2001_v0 = vunpack.i.h.bf16 %v1999_v60  ;;  %v2051_v2 = vpop.eup %2050 }
 0x5dd   :  { %622 = vadd.xlane.f32.xlu1 %v621_v63  ;;  %1920 = vmatmul.msk.f32.vlgmr.msrb.gmra.mxu0 %vm291_vm1, %v497_v61  ;;  %v753_v4 = vsel %vm291_vm1, %v2051_v2, 0.0  ;;  %v233_v63 = vld [vmem:[%s2938_s12 + $0x18] sm:$0xff] }
 0x5de   :  { %652 = vmatpush.msra.mxu0 %v2000_v62  ;;  %678 = vmatpush.msrb.mxu1 %v2001_v0  ;;  %v232_v0 = vld [vmem:[%s2938_s12 + $0x10] sm:$0xff] }
 0x5df   :  { %1927 = vmatmul.msk.f32.vlgmr.msrb.gmra.mxu1 %vm291_vm1, %v630_v1  ;;  %955 = vmatpush.msrb.mxu3 %v233_v63  ;;  %v231_v1 = vld [vmem:[%s2938_s12 + $0x8] sm:$0xff] }
 0x5e1   :  { %956 = vmatpush.msrb.mxu3 %v232_v0 }
 0x5e3   :  { %v764_v3 = vpop.permute.xlu0 %763  ;;  %957 = vmatpush.msrb.mxu3 %v231_v1 }
 0x5e4   :  { %784 = vmatpush.msrb.mxu0 %v764_v3 }
 0x5e5   :  { %754 = vadd.xlane.f32.xlu1 %v753_v4 }
 0x5fe   :  { %789 = vrot.lane.b32.xlu1 %v2491_v23, %s2949_s8 }
 0x648   :  { %v758_v5 = vpop.xlane.xlu1 %757 }
 0x650   :  { %v623_v6 = vpop.xlane.xlu1 %622 }
 0x651   :  { %2052 = vrcp.f32 %v623_v6 }
 0x657   :  { %v2053_v7 = vpop.eup %2052 }
 0x658   :  { %v629_v8 = vmul.f32 %v2053_v7, %v2047_v57  ;;  %v755_v9 = vpop.xlane.xlu1 %754 }
 0x659   :  { %2054 = vrcp.f32 %v755_v9  ;;  %v245_v9 = vld [vmem:[%s2940_s14 + $0x30] sm:$0xff] }
 0x65a   :  { %v522_v10 = vpop.f32.mrf.mxu0  ;;  %1926 = vmatmul.msk.f32.vlgmr.msra.gmra.mxu0 %vm291_vm1, %v629_v8  ;;  %2056 = vrcp.f32 %v758_v5  ;;  %v246_v8 = vld [vmem:[%s2940_s14 + $0x38] sm:$0xff] }
 0x65b   :  { %817 = vrot.lane.b32.xlu0 %v522_v10, %s2959_s11  ;;  %2058 = vrcp.f32 %v2332_v48  ;;  %984 = vmatpush.msra.mxu0 %v246_v8  ;;  %v213_v8 = vld [vmem:[%s2930_s4 + $0x30] sm:$0xff] }
 0x65c   :  { %v680_v22 = vpop.f32.mrf.mxu1 }
 0x65d   :  { %985 = vmatpush.msra.mxu0 %v245_v9  ;;  %v212_v9 = vld [vmem:[%s2930_s4 + $0x28] sm:$0xff] }
 0x65f   :  { %v2055_v11 = vpop.eup %2054 }
 0x660   :  { %v761_v12 = vmul.f32 %v2055_v11, %v2051_v2  ;;  %v2057_v15 = vpop.eup %2056  ;;  %v230_v2 = vld [vmem:[%s2938_s12] sm:$0xff]  ;;  %v244_v11 = vld [vmem:[%s2940_s14 + $0x28] sm:$0xff] }
 0x661   :  { %v762_v16 = vmul.f32 %v2057_v15, %v2043_v51  ;;  %v2059_v49 = vpop.eup %2058  ;;  %958 = vmatpush.msrb.mxu3 %v230_v2  ;;  %986 = vmatpush.msra.mxu0 %v244_v11 }
 0x662   :  { %1932 = vmatmul.msk.f32.vlgmr.msrb.gmra.mxu0 %vm291_vm1, %v761_v12  ;;  %v886_v50 = vmul.f32 32.0, %v2059_v49  ;;  %vm890_vm4 = vweird.f32 %v2059_v49 }
 0x664   :  { %v887_v51 = vsub.f32 1.0, %v886_v50 }
 0x666   :  { %v888_v52 = vmul.f32 %v2059_v49, %v887_v51 }
 0x668   :  { %v889_v53 = vadd.f32 %v2059_v49, %v888_v52  ;;  %v2687_v52 = vld [vmem:[%s2941_s15] sm:$0x3] }
 0x66a   :  { %v2621_v21 = vsel %vm890_vm4, %v2059_v49, %v889_v53  ;;  %v968_v53 = vperm.slane %v2687_v52, 0 }
 0x670   :  { %v790_v23 = vpop.permute.xlu1 %789 }
 0x671   :  { %810 = vmatpush.msra.mxu1 %v790_v23  ;;  %v243_v23 = vld [vmem:[%s2940_s14 + $0x20] sm:$0xff] }
 0x672   :  { %1933 = vmatmul.msk.f32.vlgmr.msra.gmra.mxu1 %vm291_vm1, %v762_v16  ;;  %987 = vmatpush.msra.mxu0 %v243_v23 }
 0x6cd   :  { %v818_v28 = vpop.permute.xlu0 %817 }
 0x6ce   :  { %v839_v30 = vsel %vm291_vm1, %v2554_v13, %v818_v28  ;;  %v2614_v13 = vld [vmem:[%s2933_s7] sm:$0x3] }
 0x6cf   :  { %v847_v40 = vperm.slane %v2614_v13, 0 }
 0x6d7   :  { %v654_v17 = vpop.f32.mrf.mxu0 }
 0x6d8   :  { %825 = vrot.lane.b32.xlu2 %v654_v17, %s2950_s18  ;;  %v2653_v17 = vld [vmem:[#allocation10] sm:$0x3] }
 0x6df   :  { %v786_v19 = vpop.f32.mrf.mxu0 }
 0x6e0   :  { %819 = vrot.lane.b32.xlu2 %v2558_v20, %s2959_s11  ;;  %833 = vrot.lane.b32.xlu0 %v786_v19, %s2331_s30  ;;  %v218_v20 = vld [vmem:[%s2932_s6 + $0x8] sm:$0xff] }
 0x6e1   :  { %868 = vmatpush.msra.mxu2 %v218_v20  ;;  %v930_v20 = vperm.slane %v2653_v17, 0 }
 0x6e3   :  { %869 = vmatpush.msra.mxu2 %v217_v27 }
 0x6e8   :  { %827 = vrot.lane.b32.xlu0 %v680_v22, %s2950_s18 }
 0x6ef   :  { %v812_v24 = vpop.f32.mrf.mxu1 }
 0x6f0   :  { %835 = vrot.lane.b32.xlu1 %v812_v24, %s2331_s30  ;;  %v242_v24 = vld [vmem:[%s2940_s14 + $0x18] sm:$0xff] }
 0x6f1   :  { %988 = vmatpush.msra.mxu0 %v242_v24 }
 0x732   :  { %v826_v29 = vpop.permute.xlu2 %825 }
 0x733   :  { %v842_v31 = vsel %vm841_vm2, %v839_v30, %v826_v29  ;;  %v933_v29 = vperm.slane %v2661_v26, 0 }
 0x73a   :  { %v820_v34 = vpop.permute.xlu2 %819 }
 0x73b   :  { %v840_v36 = vsel %vm291_vm1, %v2528_v54, %v820_v34 }
 0x752   :  { %v834_v32 = vpop.permute.xlu0 %833 }
 0x753   :  { %v845_v33 = vsel %vm844_vm3, %v842_v31, %v834_v32 }
 0x754   :  { %1934 = vmatmul.msk.f32.vlgmr.msra.gmra.mxu2 %vm173_vm0, %v845_v33 }
 0x75a   :  { %v828_v35 = vpop.permute.xlu0 %827 }
 0x75b   :  { %v843_v37 = vsel %vm841_vm2, %v840_v36, %v828_v35 }
 0x762   :  { %v836_v38 = vpop.permute.xlu1 %835 }
 0x763   :  { %v846_v39 = vsel %vm844_vm3, %v843_v37, %v836_v38 }
 0x764   :  { %1935 = vmatmul.msk.f32.gmra.mxu2 %vm173_vm0, %v846_v39 }
 0x7d7   :  { %v871_v41 = vpop.f32.mrf.mxu2 }
 0x7d8   :  { %v872_v42 = vadd.f32 %v871_v41, %v847_v40 }
 0x7da   :  { %v877_v43 = vadd.f32 %v872_v42, %v2476_v14  ;;  %v241_v42 = vld [vmem:[%s2940_s14 + $0x10] sm:$0xff] }
 0x7db   :  { %989 = vmatpush.msra.mxu0 %v241_v42 }
 0x7dc   :  { %v879_v54 = vsel %vm173_vm0, %v877_v43, 0.0 }
 0x7dd   :  { %880 = vadd.xlane.f32.xlu2 %v879_v54  ;;  %v239_v54 = vld [vmem:[%s2940_s14] sm:$0xff] }
 0x7e7   :  { %v874_v44 = vpop.f32.mrf.mxu2 }
 0x7e8   :  { %v875_v45 = vadd.f32 %v874_v44, %v847_v40  ;;  %v2679_v44 = vld [vmem:[%s2939_s13] sm:$0x3] }
 0x7ea   :  { %v878_v46 = vadd.f32 %v875_v45, %v2480_v18  ;;  %v936_v45 = vperm.slane %v2679_v44, 0 }
 0x7ec   :  { %v882_v47 = vsel %vm173_vm0, %v878_v46, 0.0 }
 0x7ed   :  { %883 = vadd.xlane.f32.xlu0 %v882_v47 }
 0x850   :  { %v881_v14 = vpop.xlane.xlu2 %880 }
 0x851   :  { %v892_v55 = vmul.f32 %v2621_v21, %v881_v14 }
 0x853   :  { %v894_v56 = vsub.f32 %v877_v43, %v892_v55  ;;  %v240_v43 = vld [vmem:[%s2940_s14 + $0x8] sm:$0xff] }
 0x854   :  { %990 = vmatpush.msra.mxu0 %v240_v43 }
 0x855   :  { %v896_v57 = vmul.f32 %v894_v56, %v894_v56 }
 0x856   :  { %991 = vmatpush.msra.mxu0 %v239_v54 }
 0x857   :  { %v898_v18 = vsel %vm173_vm0, %v896_v57, 0.0 }
 0x858   :  { %899 = vadd.xlane.f32.xlu1 %v898_v18 }
 0x860   :  { %v884_v58 = vpop.xlane.xlu0 %883 }
 0x861   :  { %v893_v59 = vmul.f32 %v2621_v21, %v884_v58 }
 0x863   :  { %v895_v60 = vsub.f32 %v878_v46, %v893_v59 }
 0x865   :  { %v897_v61 = vmul.f32 %v895_v60, %v895_v60 }
 0x867   :  { %v901_v62 = vsel %vm173_vm0, %v897_v61, 0.0 }
 0x868   :  { %902 = vadd.xlane.f32.xlu2 %v901_v62 }
 0x8cb   :  { %v900_v3 = vpop.xlane.xlu1 %899 }
 0x8cc   :  { %v904_v4 = vmul.f32 %v900_v3, %v2621_v21 }
 0x8ce   :  { %v906_v5 = vadd.f32 1e-05, %v904_v4 }
 0x8d0   :  { %2060 = vrsqrt.f32 %v906_v5  ;;  %vm914_vm6 = vweird.f32 %v906_v5 }
 0x8d6   :  { %v2061_v6 = vpop.eup %2060 }
 0x8d7   :  { %v909_v7 = vmul.f32 %v2061_v6, %v906_v5  ;;  %vm915_vm5 = vweird.f32 %v2061_v6 }
 0x8d8   :  { %vm916_vm7 = vmor %vm914_vm6, %vm915_vm5 }
 0x8d9   :  { %v910_v10 = vmul.f32 %v2061_v6, %v909_v7  ;;  %v214_v7 = vld [vmem:[%s2930_s4 + $0x38] sm:$0xff] }
 0x8da   :  { %1072 = vmatpush.msrb.mxu1 %v214_v7 }
 0x8db   :  { %v911_v12 = vmul.f32 0.5, %v910_v10  ;;  %v903_v15 = vpop.xlane.xlu2 %902  ;;  %v211_v10 = vld [vmem:[%s2930_s4 + $0x20] sm:$0xff] }
 0x8dc   :  { %v905_v16 = vmul.f32 %v903_v15, %v2621_v21  ;;  %1073 = vmatpush.msrb.mxu1 %v213_v8 }
 0x8dd   :  { %v912_v19 = vsub.f32 1.5, %v911_v12 }
 0x8de   :  { %v907_v22 = vadd.f32 1e-05, %v905_v16  ;;  %1074 = vmatpush.msrb.mxu1 %v212_v9 }
 0x8df   :  { %v913_v25 = vmul.f32 %v2061_v6, %v912_v19 }
 0x8e0   :  { %2062 = vrsqrt.f32 %v907_v22  ;;  %vm924_vm9 = vweird.f32 %v907_v22  ;;  %1075 = vmatpush.msrb.mxu1 %v211_v10 }
 0x8e1   :  { %v917_v27 = vsel %vm916_vm7, %v2061_v6, %v913_v25 }
 0x8e2   :  { %v928_v28 = vmul.f32 %v917_v27, %v894_v56 }
 0x8e4   :  { %v931_v30 = vmul.f32 %v930_v20, %v928_v28 }
 0x8e6   :  { %v2063_v31 = vpop.eup %2062  ;;  %v934_v32 = vadd.f32 %v933_v29, %v931_v30  ;;  %v2715_v30 = vld [vmem:[#allocation11] sm:$0x3] }
 0x8e7   :  { %v919_v33 = vmul.f32 %v2063_v31, %v907_v22  ;;  %vm925_vm8 = vweird.f32 %v2063_v31 }
 0x8e8   :  { %1936 = vmatmul.msk.f32.vlgmr.msrb.gmra.mxu3 %vm173_vm0, %v934_v32  ;;  %vm926_vm10 = vmor %vm924_vm9, %vm925_vm8 }
 0x8e9   :  { %v920_v34 = vmul.f32 %v2063_v31, %v919_v33 }
 0x8eb   :  { %v921_v35 = vmul.f32 0.5, %v920_v34  ;;  %v1048_v34 = vperm.slane %v2715_v30, 0 }
 0x8ed   :  { %v922_v36 = vsub.f32 1.5, %v921_v35 }
 0x8ef   :  { %v923_v37 = vmul.f32 %v2063_v31, %v922_v36 }
 0x8f1   :  { %v927_v38 = vsel %vm926_vm10, %v2063_v31, %v923_v37 }
 0x8f2   :  { %v929_v39 = vmul.f32 %v927_v38, %v895_v60 }
 0x8f4   :  { %v932_v40 = vmul.f32 %v930_v20, %v929_v39  ;;  %v2713_v20 = vld [vmem:[%s2936_s10] sm:$0x3] }
 0x8f5   :  { %v1045_v31 = vperm.slane %v2713_v20, 0 }
 0x8f6   :  { %v935_v41 = vadd.f32 %v933_v29, %v932_v40 }
 0x8f8   :  { %1937 = vmatmul.msk.f32.gmra.mxu3 %vm173_vm0, %v935_v41 }
 0x96b   :  { %v960_v46 = vpop.f32.mrf.mxu3 }
 0x96c   :  { %v961_v47 = vadd.f32 %v960_v46, %v936_v45 }
 0x96e   :  { %v966_v48 = vmax.f32 %v961_v47, 0.0  ;;  %v2024_v47 = vld [vmem:[%s2931_s5 + $0x1] ss:$0 sm:$0xff]  ;;  %s2961_s5 = smov 40  }
 0x970   :  { %1938 = vmatmul.msk.f32.vlgmr.msra.gmra.mxu0 %vm969_vm11, %v966_v48 }
 0x97b   :  { %v963_v49 = vpop.f32.mrf.mxu3 }
 0x97c   :  { %v964_v50 = vadd.f32 %v963_v49, %v936_v45 }
 0x97e   :  { %v967_v51 = vmax.f32 %v964_v50, 0.0 }
 0x980   :  { %1939 = vmatmul.msk.f32.gmra.mxu0 %vm969_vm11, %v967_v51 }
 0x9ed   :  { %v993_v14 = vpop.f32.mrf.mxu0 }
 0x9ee   :  { %v994_v55 = vadd.f32 %v993_v14, %v968_v53 }
 0x9f0   :  { %v999_v56 = vadd.f32 %v994_v55, %v934_v32 }
 0x9f2   :  { %v1001_v57 = vsel %vm173_vm0, %v999_v56, 0.0 }
 0x9f3   :  { %1002 = vadd.xlane.f32.xlu0 %v1001_v57 }
 0x9fd   :  { %v996_v18 = vpop.f32.mrf.mxu0 }
 0x9fe   :  { %v997_v58 = vadd.f32 %v996_v18, %v968_v53 }
 0xa00   :  { %v1000_v59 = vadd.f32 %v997_v58, %v935_v41 }
 0xa02   :  { %v1004_v60 = vsel %vm173_vm0, %v1000_v59, 0.0 }
 0xa03   :  { %1005 = vadd.xlane.f32.xlu1 %v1004_v60 }
 0xa66   :  { %v1003_v61 = vpop.xlane.xlu0 %1002 }
 0xa67   :  { %v1007_v62 = vmul.f32 %v1003_v61, %v2621_v21 }
 0xa69   :  { %v1009_v63 = vsub.f32 %v999_v56, %v1007_v62 }
 0xa6b   :  { %v1011_v0 = vmul.f32 %v1009_v63, %v1009_v63 }
 0xa6d   :  { %v1013_v1 = vsel %vm173_vm0, %v1011_v0, 0.0 }
 0xa6e   :  { %1014 = vadd.xlane.f32.xlu2 %v1013_v1 }
 0xa76   :  { %v1006_v2 = vpop.xlane.xlu1 %1005 }
 0xa77   :  { %v1008_v3 = vmul.f32 %v1006_v2, %v2621_v21 }
 0xa79   :  { %v1010_v4 = vsub.f32 %v1000_v59, %v1008_v3 }
 0xa7b   :  { %v1012_v5 = vmul.f32 %v1010_v4, %v1010_v4 }
 0xa7d   :  { %v1016_v6 = vsel %vm173_vm0, %v1012_v5, 0.0 }
 0xa7e   :  { %1017 = vadd.xlane.f32.xlu0 %v1016_v6 }
 0xae1   :  { %v1015_v11 = vpop.xlane.xlu2 %1014 }
 0xae2   :  { %v1019_v12 = vmul.f32 %v1015_v11, %v2621_v21 }
 0xae4   :  { %v1021_v15 = vadd.f32 1e-05, %v1019_v12 }
 0xae6   :  { %2064 = vrsqrt.f32 %v1021_v15  ;;  %vm1029_vm13 = vweird.f32 %v1021_v15 }
 0xaec   :  { %v2065_v16 = vpop.eup %2064 }
 0xaed   :  { %v1024_v23 = vmul.f32 %v2065_v16, %v1021_v15  ;;  %vm1030_vm12 = vweird.f32 %v2065_v16 }
 0xaee   :  { %vm1031_vm14 = vmor %vm1029_vm13, %vm1030_vm12 }
 0xaef   :  { %v1025_v19 = vmul.f32 %v2065_v16, %v1024_v23 }
 0xaf1   :  { %v1026_v22 = vmul.f32 0.5, %v1025_v19  ;;  %v1018_v24 = vpop.xlane.xlu0 %1017 }
 0xaf2   :  { %v1020_v25 = vmul.f32 %v1018_v24, %v2621_v21 }
 0xaf3   :  { %v1027_v27 = vsub.f32 1.5, %v1026_v22 }
 0xaf4   :  { %v1022_v28 = vadd.f32 1e-05, %v1020_v25 }
 0xaf5   :  { %v1028_v29 = vmul.f32 %v2065_v16, %v1027_v27 }
 0xaf6   :  { %2066 = vrsqrt.f32 %v1022_v28  ;;  %vm1039_vm4 = vweird.f32 %v1022_v28 }
 0xaf7   :  { %v1032_v32 = vsel %vm1031_vm14, %v2065_v16, %v1028_v29 }
 0xaf8   :  { %v1043_v33 = vmul.f32 %v1032_v32, %v1009_v63 }
 0xafa   :  { %v1046_v35 = vmul.f32 %v1045_v31, %v1043_v33 }
 0xafc   :  { %v2067_v36 = vpop.eup %2066  ;;  %v2719_v37 = vadd.f32 %v1048_v34, %v1046_v35 }
 0xafd   :  { %v1034_v38 = vmul.f32 %v2067_v36, %v1022_v28  ;;  %vm1040_vm15 = vweird.f32 %v2067_v36 }
 0xafe   :  { %1940 = vmatmul.msk.f32.vlgmr.msrb.gmra.mxu1 %vm173_vm0, %v2719_v37  ;;  %vm1041_vm5 = vmor %vm1039_vm4, %vm1040_vm15  ;;  %vm1861_vm15 = vcmask 1041409  }
 0xaff   :  { %v1035_v39 = vmul.f32 %v2067_v36, %v1034_v38 }
 0xb01   :  { %v1036_v40 = vmul.f32 0.5, %v1035_v39 }
 0xb03   :  { %v1037_v41 = vsub.f32 1.5, %v1036_v40 }
 0xb05   :  { %v1038_v42 = vmul.f32 %v2067_v36, %v1037_v41 }
 0xb07   :  { %v1042_v43 = vsel %vm1041_vm5, %v2067_v36, %v1038_v42 }
 0xb08   :  { %v1044_v54 = vmul.f32 %v1042_v43, %v1010_v4 }
 0xb0a   :  { %v1047_v45 = vmul.f32 %v1045_v31, %v1044_v54 }
 0xb0c   :  { %v2723_v46 = vadd.f32 %v1048_v34, %v1047_v45 }
 0xb0e   :  { %1941 = vmatmul.msk.f32.gmra.mxu1 %vm173_vm0, %v2723_v46 }
 0xb7b   :  { %v1077_v48 = vpop.f32.mrf.mxu1 }
 0xb7c   :  { %v2730_v49 = vadd.f32 %v2024_v47, %v1077_v48 }
 0xb7e   :  { %1215 = vrot.lane.b32.xlu0 %v2730_v49, %s2321_s22  ;;  %1084 = vrot.lane.b32.xlu1 %v2730_v49, %s2319_s28 }
 0xb86   :  { %1213 = vrot.lane.b32.xlu1 %v2730_v49, %s2322_s2 }
 0xb8b   :  { %v1080_v50 = vpop.f32.mrf.mxu1 }
 0xb8c   :  { %v2738_v51 = vadd.f32 %v2024_v47, %v1080_v50 }
 0xb8e   :  { %1241 = vrot.lane.b32.xlu1 %v2738_v51, %s2322_s2  ;;  %1243 = vrot.lane.b32.xlu0 %v2738_v51, %s2321_s22 }
 0xb8f   :  { %1111 = vrot.lane.b32.xlu2 %v2738_v51, %s2319_s28  ;;  %s2962_s28 = smov 16  }
 0xb96   :  { %1479 = vrot.lane.b32.xlu1 %v2730_v49, %s2327_s20  ;;  %1345 = vrot.lane.b32.xlu0 %v2730_v49, %s2323_s27 }
 0xb97   :  { %1347 = vrot.lane.b32.xlu2 %v2730_v49, %s2324_s0 }
 0xb9e   :  { %1507 = vrot.lane.b32.xlu1 %v2738_v51, %s2327_s20  ;;  %1373 = vrot.lane.b32.xlu0 %v2738_v51, %s2323_s27 }
 0xb9f   :  { %1375 = vrot.lane.b32.xlu2 %v2738_v51, %s2324_s0 }
 0xba6   :  { %1505 = vrot.lane.b32.xlu0 %v2738_v51, %s2325_s1 }
 0xba7   :  { %1477 = vrot.lane.b32.xlu2 %v2730_v49, %s2325_s1 }
 0xbe9   :  { %v1112_v53 = vpop.permute.xlu2 %1111 }
 0xbea   :  { %1944 = vmatpush.xpose.msk.msra.mxu3 %vm291_vm1, %v1112_v53 }
 0xbed   :  { %1945 = vmatmul.msk.f32.vlgmr.msra.gmra.mxu3 %vm291_vm1, %v2738_v51 }
 0xbf0   :  { %v1085_v14 = vpop.permute.xlu1 %1084  ;;  %v1216_v55 = vpop.permute.xlu0 %1215 }
 0xbf1   :  { %v1348_v56 = vpop.permute.xlu2 %1347  ;;  %1942 = vmatpush.xpose.msk.msrb.mxu2 %vm291_vm1, %v1085_v14  ;;  %1948 = vmatpush.xpose.msk.msrb.mxu3 %vm291_vm1, %v1216_v55 }
 0xbf4   :  { %1943 = vmatmul.msk.f32.vlgmr.msrb.gmra.mxu2 %vm291_vm1, %v2730_v49 }
 0xbf5   :  { %1954 = vmatpush.xpose.msk.msra.mxu3 %vm291_vm1, %v1348_v56 }
 0xbf8   :  { %v1214_v57 = vpop.permute.xlu1 %1213 }
 0xbf9   :  { %1949 = vmatmul.msk.f32.vlgmr.msrb.gmra.mxu3 %vm291_vm1, %v1214_v57  ;;  %v1376_v59 = vpop.permute.xlu2 %1375 }
 0xc00   :  { %v1242_v18 = vpop.permute.xlu1 %1241  ;;  %v1244_v58 = vpop.permute.xlu0 %1243 }
 0xc01   :  { %1950 = vmatpush.xpose.msk.msrb.mxu0 %vm291_vm1, %v1244_v58  ;;  %v1478_v62 = vpop.permute.xlu2 %1477  ;;  %v2002_v58 = vpack.i.bf16 %v2738_v51, %v2730_v49 }
 0xc04   :  { %1951 = vmatmul.msk.f32.vlgmr.msrb.gmra.mxu0 %vm291_vm1, %v1242_v18 }
 0xc05   :  { %1956 = vmatpush.xpose.msk.msra.mxu0 %vm291_vm1, %v1376_v59 }
 0xc08   :  { %v1480_v60 = vpop.permute.xlu1 %1479  ;;  %v1346_v61 = vpop.permute.xlu0 %1345 }
 0xc09   :  { %1955 = vmatmul.msk.f32.vlgmr.msra.gmra.mxu3 %vm291_vm1, %v1346_v61 }
 0xc0a   :  { %1960 = vmatpush.xpose.msk.msrb.mxu3 %vm291_vm1, %v1480_v60 }
 0xc10   :  { %v1508_v63 = vpop.permute.xlu1 %1507  ;;  %v1374_v0 = vpop.permute.xlu0 %1373 }
 0xc11   :  { %1957 = vmatmul.msk.f32.vlgmr.msra.gmra.mxu0 %vm291_vm1, %v1374_v0  ;;  %1961 = vmatmul.msk.f32.vlgmr.msrb.gmra.mxu3 %vm291_vm1, %v1478_v62 }
 0xc12   :  { %1962 = vmatpush.xpose.msk.msrb.mxu0 %vm291_vm1, %v1508_v63 }
 0xc18   :  { %v1506_v1 = vpop.permute.xlu0 %1505 }
 0xc19   :  { %1963 = vmatmul.msk.f32.vlgmr.msrb.gmra.mxu0 %vm291_vm1, %v1506_v1 }
 0xc70   :  { %v1134_v2 = vpop.f32.mrf.mxu3 }
 0xc71   :  { %v1138_v3 = vmul.f32 0.35355338, %v1134_v2 }
 0xc73   :  { %v1142_v4 = vsel %vm291_vm1, %v1138_v3, -inf }
 0xc74   :  { %1143 = vmax.xlane.f32.xlu1 %v1142_v4 }
 0xc77   :  { %v1107_v5 = vpop.f32.mrf.mxu2 }
 0xc78   :  { %v1137_v6 = vmul.f32 0.35355338, %v1107_v5 }
 0xc7a   :  { %v1139_v7 = vsel %vm291_vm1, %v1137_v6, -inf }
 0xc7b   :  { %1140 = vmax.xlane.f32.xlu2 %v1139_v7 }
 0xc7c   :  { %v1238_v10 = vpop.f32.mrf.mxu3 }
 0xc7d   :  { %v1269_v22 = vmul.f32 0.35355338, %v1238_v10 }
 0xc7f   :  { %v1271_v29 = vsel %vm291_vm1, %v1269_v22, -inf }
 0xc81   :  { %v1266_v8 = vpop.f32.mrf.mxu0 }
 0xc82   :  { %v1270_v9 = vmul.f32 0.35355338, %v1266_v8 }
 0xc84   :  { %v1274_v11 = vsel %vm291_vm1, %v1270_v9, -inf }
 0xc85   :  { %1275 = vmax.xlane.f32.xlu2 %v1274_v11 }
 0xc8c   :  { %v1370_v12 = vpop.f32.mrf.mxu3 }
 0xc8d   :  { %v1401_v32 = vmul.f32 0.35355338, %v1370_v12 }
 0xc8e   :  { %v1398_v15 = vpop.f32.mrf.mxu0 }
 0xc8f   :  { %v1402_v16 = vmul.f32 0.35355338, %v1398_v15  ;;  %v1403_v33 = vsel %vm291_vm1, %v1401_v32, -inf }
 0xc91   :  { %v1406_v23 = vsel %vm291_vm1, %v1402_v16, -inf }
 0xc92   :  { %1407 = vmax.xlane.f32.xlu0 %v1406_v23 }
 0xc94   :  { %v1502_v19 = vpop.f32.mrf.mxu3 }
 0xc95   :  { %v1533_v24 = vmul.f32 0.35355338, %v1502_v19 }
 0xc96   :  { %v1530_v25 = vpop.f32.mrf.mxu0 }
 0xc97   :  { %v2784_v27 = vmul.f32 0.35355338, %v1530_v25  ;;  %v1535_v28 = vsel %vm291_vm1, %v1533_v24, -inf }
 0xc98   :  { %1536 = vmax.xlane.f32.xlu2 %v1535_v28 }
 0xc99   :  { %v1538_v31 = vsel %vm291_vm1, %v2784_v27, -inf }
 0xc9a   :  { %1272 = vmax.xlane.f32.xlu0 %v1271_v29  ;;  %1539 = vmax.xlane.f32.xlu1 %v1538_v31 }
 0xca2   :  { %1404 = vmax.xlane.f32.xlu1 %v1403_v33 }
 0xce7   :  { %v1144_v38 = vpop.xlane.xlu1 %1143 }
 0xce8   :  { %v1146_v43 = vsub.f32 %v1138_v3, %v1144_v38 }
 0xcea   :  { %v1149_v45 = vmul.f32 1.442695, %v1146_v43 }
 0xcee   :  { %v1141_v34 = vpop.xlane.xlu2 %1140 }
 0xcef   :  { %v1145_v35 = vsub.f32 %v1137_v6, %v1141_v34 }
 0xcf1   :  { %v1147_v36 = vmul.f32 1.442695, %v1145_v35 }
 0xcf3   :  { %2068 = vpow2.f32 %v1147_v36 }
 0xcf8   :  { %v1276_v39 = vpop.xlane.xlu2 %1275 }
 0xcf9   :  { %v2791_v40 = vpop.eup %2068  ;;  %v1278_v41 = vsub.f32 %v1270_v9, %v1276_v39 }
 0xcfa   :  { %v1151_v42 = vsel %vm291_vm1, %v2791_v40, 0.0 }
 0xcfb   :  { %v1281_v54 = vmul.f32 1.442695, %v1278_v41  ;;  %1152 = vadd.xlane.f32.xlu0 %v1151_v42 }
 0xcfd   :  { %2070 = vpow2.f32 %v1281_v54 }
 0xcfe   :  { %2072 = vpow2.f32 %v1149_v45 }
 0xd03   :  { %v2795_v47 = vpop.eup %2070 }
 0xd04   :  { %v1286_v48 = vsel %vm291_vm1, %v2795_v47, 0.0  ;;  %v2073_v55 = vpop.eup %2072 }
 0xd05   :  { %1287 = vadd.xlane.f32.xlu2 %v1286_v48  ;;  %v1408_v50 = vpop.xlane.xlu0 %1407  ;;  %v1154_v56 = vsel %vm291_vm1, %v2073_v55, 0.0 }
 0xd06   :  { %v1410_v53 = vsub.f32 %v1402_v16, %v1408_v50 }
 0xd08   :  { %v1413_v14 = vmul.f32 1.442695, %v1410_v53 }
 0xd0a   :  { %2074 = vpow2.f32 %v1413_v14 }
 0xd0b   :  { %v1537_v4 = vpop.xlane.xlu2 %1536 }
 0xd0c   :  { %v1541_v5 = vsub.f32 %v1533_v24, %v1537_v4  ;;  %v223_v4 = vld [vmem:[%s2932_s6 + $0x30] sm:$0xff] }
 0xd0d   :  { %1155 = vadd.xlane.f32.xlu2 %v1154_v56  ;;  %v1540_v57 = vpop.xlane.xlu1 %1539  ;;  %v1273_v18 = vpop.xlane.xlu0 %1272 }
 0xd0e   :  { %v1277_v59 = vsub.f32 %v1269_v22, %v1273_v18  ;;  %v1543_v6 = vmul.f32 1.442695, %v1541_v5  ;;  %v1542_v9 = vsub.f32 %v2784_v27, %v1540_v57  ;;  %v222_v5 = vld [vmem:[%s2932_s6 + $0x28] sm:$0xff] }
 0xd0f   :  { %2003 = vrot.lane.b32.xlu0 %v2002_v58, %s2320_s29 }
 0xd10   :  { %v2803_v60 = vpop.eup %2074  ;;  %v1279_v61 = vmul.f32 1.442695, %v1277_v59  ;;  %v1545_v10 = vmul.f32 1.442695, %v1542_v9 }
 0xd11   :  { %v1418_v62 = vsel %vm291_vm1, %v2803_v60, 0.0 }
 0xd12   :  { %1419 = vadd.xlane.f32.xlu1 %v1418_v62  ;;  %2076 = vpow2.f32 %v1279_v61 }
 0xd15   :  { %v1405_v63 = vpop.xlane.xlu1 %1404 }
 0xd16   :  { %v1409_v0 = vsub.f32 %v1401_v32, %v1405_v63 }
 0xd18   :  { %v1411_v1 = vmul.f32 1.442695, %v1409_v0  ;;  %v2077_v2 = vpop.eup %2076 }
 0xd19   :  { %v1283_v3 = vsel %vm291_vm1, %v2077_v2, 0.0 }
 0xd1a   :  { %2078 = vpow2.f32 %v1411_v1  ;;  %1284 = vadd.xlane.f32.xlu1 %v1283_v3 }
 0xd1b   :  { %2080 = vpow2.f32 %v1543_v6  ;;  %v221_v6 = vld [vmem:[%s2932_s6 + $0x20] sm:$0xff] }
 0xd1c   :  { %2082 = vpow2.f32 %v1545_v10 }
 0xd20   :  { %v2079_v49 = vpop.eup %2078 }
 0xd21   :  { %v1415_v51 = vsel %vm291_vm1, %v2079_v49, 0.0  ;;  %v2081_v7 = vpop.eup %2080 }
 0xd22   :  { %1416 = vadd.xlane.f32.xlu1 %v1415_v51  ;;  %v1547_v8 = vsel %vm291_vm1, %v2081_v7, 0.0  ;;  %v2083_v11 = vpop.eup %2082  ;;  %v224_v51 = vld [vmem:[%s2932_s6 + $0x38] sm:$0xff]  ;;  %s2963_s6 = sld [smem:[#allocation23_spill]] }
 0xd23   :  { %v1550_v12 = vsel %vm291_vm1, %v2083_v11, 0.0  ;;  %1658 = vmatpush.msra.mxu3 %v224_v51  ;;  %v251_v51 = vld [vmem:[%s2940_s14 + $0x60] sm:$0xff] }
 0xd25   :  { %2008 = vrot.lane.b32.xlu2 %v2002_v58, %s2326_s3  ;;  %1659 = vmatpush.msra.mxu3 %v223_v4 }
 0xd27   :  { %1660 = vmatpush.msra.mxu3 %v222_v5  ;;  %v250_v5 = vld [vmem:[%s2940_s14 + $0x58] sm:$0xff] }
 0xd28   :  { %s1893_s20 = sshll.u32 %s2963_s6, 4  ;;  %s1894_s20 = int_to_ptr.hbm [resolvable:$true] %s1893_s20 }
 0xd29   :  { %1661 = vmatpush.msra.mxu3 %v221_v6 }
 0xd39   :  { %1548 = vadd.xlane.f32.xlu0 %v1547_v8 }
 0xd3b   :  { %2013 = vrot.lane.b32.xlu1 %v2002_v58, %s2329_s16 }
 0xd43   :  { %2018 = vrot.lane.b32.xlu1 %v2002_v58, %s2961_s5 }
 0xd4e   :  { %1551 = vadd.xlane.f32.xlu2 %v1550_v12 }
 0xd6e   :  { %v1153_v15 = vpop.xlane.xlu0 %1152 }
 0xd6f   :  { %2084 = vrcp.f32 %v1153_v15 }
 0xd75   :  { %v2085_v23 = vpop.eup %2084 }
 0xd76   :  { %v1159_v27 = vmul.f32 %v2085_v23, %v2791_v40 }
 0xd78   :  { %v1288_v16 = vpop.xlane.xlu2 %1287 }
 0xd80   :  { %v1156_v19 = vpop.xlane.xlu2 %1155 }
 0xd81   :  { %2086 = vrcp.f32 %v1156_v19  ;;  %v2004_v22 = vpop.permute.xlu0 %2003 }
 0xd82   :  { %v2006_v24 = vunpack.i.h.bf16 %v2004_v22  ;;  %v2005_v25 = vunpack.i.l.bf16 %v2004_v22  ;;  %2088 = vrcp.f32 %v1288_v16 }
 0xd84   :  { %1182 = vmatpush.msra.mxu1 %v2005_v25  ;;  %1208 = vmatpush.msra.mxu2 %v2006_v24  ;;  %v1639_v25 = vperm.slane %v2614_v13, 1 }
 0xd85   :  { %v1420_v28 = vpop.xlane.xlu1 %1419  ;;  %1946 = vmatmul.msk.f32.vlgmr.msra.gmra.mxu1 %vm291_vm1, %v1159_v27 }
 0xd87   :  { %v2087_v29 = vpop.eup %2086 }
 0xd88   :  { %v1160_v31 = vmul.f32 %v2087_v29, %v2073_v55  ;;  %v2009_v32 = vpop.permute.xlu2 %2008  ;;  %v2089_v35 = vpop.eup %2088 }
 0xd89   :  { %v2011_v33 = vunpack.i.h.bf16 %v2009_v32  ;;  %v2010_v34 = vunpack.i.l.bf16 %v2009_v32  ;;  %v1292_v38 = vmul.f32 %v2089_v35, %v2795_v47 }
 0xd8a   :  { %1947 = vmatmul.msk.f32.vlgmr.msra.gmra.mxu2 %vm291_vm1, %v1160_v31 }
 0xd8b   :  { %1314 = vmatpush.msrb.mxu1 %v2010_v34  ;;  %1340 = vmatpush.msrb.mxu2 %v2011_v33 }
 0xd8d   :  { %v1285_v36 = vpop.xlane.xlu1 %1284 }
 0xd8e   :  { %2090 = vrcp.f32 %v1285_v36 }
 0xd8f   :  { %2092 = vrcp.f32 %v1420_v28 }
 0xd92   :  { %1953 = vmatmul.msk.f32.vlgmr.msrb.gmra.mxu2 %vm291_vm1, %v1292_v38 }
 0xd94   :  { %v2091_v39 = vpop.eup %2090 }
 0xd95   :  { %v1291_v40 = vmul.f32 %v2091_v39, %v2077_v2  ;;  %v1417_v41 = vpop.xlane.xlu1 %1416  ;;  %v2093_v42 = vpop.eup %2092 }
 0xd96   :  { %2094 = vrcp.f32 %v1417_v41  ;;  %v1424_v53 = vmul.f32 %v2093_v42, %v2803_v60 }
 0xd97   :  { %1952 = vmatmul.msk.f32.vlgmr.msrb.gmra.mxu1 %vm291_vm1, %v1291_v40 }
 0xd9c   :  { %v2095_v54 = vpop.eup %2094 }
 0xd9d   :  { %v1423_v14 = vmul.f32 %v2095_v54, %v2079_v49 }
 0xdac   :  { %v1549_v43 = vpop.xlane.xlu0 %1548 }
 0xdad   :  { %v2014_v45 = vpop.permute.xlu1 %2013  ;;  %2096 = vrcp.f32 %v1549_v43 }
 0xdae   :  { %v2016_v48 = vunpack.i.h.bf16 %v2014_v45  ;;  %v2015_v50 = vunpack.i.l.bf16 %v2014_v45  ;;  %v236_v45 = vld [vmem:[%s2938_s12 + $0x30] sm:$0xff] }
 0xdb0   :  { %1446 = vmatpush.msra.mxu1 %v2015_v50  ;;  %1472 = vmatpush.msra.mxu2 %v2016_v48  ;;  %v235_v48 = vld [vmem:[%s2938_s12 + $0x28] sm:$0xff]  ;;  %v234_v50 = vld [vmem:[%s2938_s12 + $0x20] sm:$0xff] }
 0xdb1   :  { %1958 = vmatmul.msk.f32.vlgmr.msra.gmra.mxu1 %vm291_vm1, %v1423_v14  ;;  %1959 = vmatmul.msk.f32.vlgmr.msra.gmra.mxu2 %vm291_vm1, %v1424_v53 }
 0xdb3   :  { %v2097_v47 = vpop.eup %2096 }
 0xdb4   :  { %v1555_v18 = vmul.f32 %v2097_v47, %v2081_v7 }
 0xdb5   :  { %v2019_v55 = vpop.permute.xlu1 %2018 }
 0xdb6   :  { %v2021_v56 = vunpack.i.h.bf16 %v2019_v55  ;;  %v2020_v57 = vunpack.i.l.bf16 %v2019_v55 }
 0xdb8   :  { %1578 = vmatpush.msrb.mxu1 %v2020_v57  ;;  %1604 = vmatpush.msrb.mxu2 %v2021_v56 }
 0xdb9   :  { %1964 = vmatmul.msk.f32.vlgmr.msrb.gmra.mxu1 %vm291_vm1, %v1555_v18 }
 0xdc1   :  { %v1552_v58 = vpop.xlane.xlu2 %1551 }
 0xdc2   :  { %2098 = vrcp.f32 %v1552_v58 }
 0xdc8   :  { %v2099_v59 = vpop.eup %2098 }
 0xdc9   :  { %v1556_v60 = vmul.f32 %v2099_v59, %v2083_v11 }
 0xdcb   :  { %1965 = vmatmul.msk.f32.vlgmr.msrb.gmra.mxu2 %vm291_vm1, %v1556_v60  ;;  %v254_v60 = vld [vmem:[%s2940_s14 + $0x78] sm:$0xff] }
 0xdcc   :  { %1768 = vmatpush.msra.mxu1 %v254_v60  ;;  %v1854_v60 = vld [vmem:[#allocation13 + $0x18] sm:$0xff] }
 0xdcd   :  { %1877 = vmatpush.msra.mxu2 %v1854_v60 }
 0xe02   :  { %v1184_v61 = vpop.f32.mrf.mxu1 }
 0xe0d   :  { %v1210_v62 = vpop.f32.mrf.mxu2 }
 0xe14   :  { %v1316_v63 = vpop.f32.mrf.mxu1 }
 0xe15   :  { %1611 = vrot.lane.b32.xlu1 %v1316_v63, %s2959_s11  ;;  %v1342_v0 = vpop.f32.mrf.mxu2 }
 0xe1d   :  { %1613 = vrot.lane.b32.xlu1 %v1342_v0, %s2959_s11  ;;  %v252_v0 = vld [vmem:[%s2940_s14 + $0x68] sm:$0xff]  ;;  %s2333_s11 = smov [#allocation14]  }
 0xe1e   :  { %s1891_s0 = sshll.u32 %s2333_s11, 4  ;;  %s1892_s0 = int_to_ptr.vmem [resolvable:$true] %s1891_s0 }
 0xe2e   :  { %v1448_v1 = vpop.f32.mrf.mxu1 }
 0xe2f   :  { %1619 = vrot.lane.b32.xlu0 %v1448_v1, %s2962_s28 }
 0xe34   :  { %v1474_v2 = vpop.f32.mrf.mxu2 }
 0xe35   :  { %1621 = vrot.lane.b32.xlu2 %v1474_v2, %s2962_s28 }
 0xe36   :  { %v1580_v3 = vpop.f32.mrf.mxu1 }
 0xe37   :  { %1627 = vrot.lane.b32.xlu1 %v1580_v3, %s2331_s30  ;;  %v1718_v3 = vperm.slane %v2661_v26, 1 }
 0xe4e   :  { %v1606_v49 = vpop.f32.mrf.mxu2 }
 0xe4f   :  { %1629 = vrot.lane.b32.xlu1 %v1606_v49, %s2331_s30 }
 0xe87   :  { %v1612_v7 = vpop.permute.xlu1 %1611 }
 0xe88   :  { %v1633_v10 = vsel %vm291_vm1, %v1184_v61, %v1612_v7  ;;  %v253_v61 = vld [vmem:[%s2940_s14 + $0x70] sm:$0xff] }
 0xe89   :  { %1769 = vmatpush.msra.mxu1 %v253_v61  ;;  %v1853_v61 = vld [vmem:[#allocation13 + $0x10] sm:$0xff] }
 0xe8a   :  { %1878 = vmatpush.msra.mxu2 %v1853_v61 }
 0xe8b   :  { %1770 = vmatpush.msra.mxu1 %v252_v0  ;;  %v1851_v0 = vld [vmem:[#allocation13] sm:$0xff] }
 0xe8d   :  { %1771 = vmatpush.msra.mxu1 %v251_v51 }
 0xe8f   :  { %v1614_v8 = vpop.permute.xlu1 %1613  ;;  %v1622_v16 = vpop.permute.xlu2 %1621  ;;  %1772 = vmatpush.msra.mxu1 %v250_v5 }
 0xe90   :  { %v1634_v23 = vsel %vm291_vm1, %v1210_v62, %v1614_v8  ;;  %v1715_v62 = vperm.slane %v2653_v17, 1 }
 0xe91   :  { %v1636_v22 = vsel %vm841_vm2, %v1634_v23, %v1622_v16 }
 0xea1   :  { %v1620_v9 = vpop.permute.xlu0 %1619 }
 0xea2   :  { %v1635_v11 = vsel %vm841_vm2, %v1633_v10, %v1620_v9 }
 0xea9   :  { %v1628_v12 = vpop.permute.xlu1 %1627 }
 0xeaa   :  { %v1637_v15 = vsel %vm844_vm3, %v1635_v11, %v1628_v12 }
 0xeab   :  { %1966 = vmatmul.msk.f32.vlgmr.msra.gmra.mxu3 %vm173_vm0, %v1637_v15 }
 0xec1   :  { %v1630_v19 = vpop.permute.xlu1 %1629 }
 0xec2   :  { %v1638_v24 = vsel %vm844_vm3, %v1636_v22, %v1630_v19  ;;  %v249_v19 = vld [vmem:[%s2940_s14 + $0x50] sm:$0xff]  ;;  %v248_v22 = vld [vmem:[%s2940_s14 + $0x48] sm:$0xff] }
 0xec3   :  { %1967 = vmatmul.msk.f32.gmra.mxu3 %vm173_vm0, %v1638_v24  ;;  %1773 = vmatpush.msra.mxu1 %v249_v19  ;;  %v247_v24 = vld [vmem:[%s2940_s14 + $0x40] sm:$0xff] }
 0xec5   :  { %1774 = vmatpush.msra.mxu1 %v248_v22 }
 0xec7   :  { %1775 = vmatpush.msra.mxu1 %v247_v24 }
 0xf2e   :  { %v1663_v27 = vpop.f32.mrf.mxu3 }
 0xf2f   :  { %v1664_v28 = vadd.f32 %v1663_v27, %v1639_v25 }
 0xf31   :  { %v1669_v29 = vadd.f32 %v1664_v28, %v2719_v37 }
 0xf33   :  { %v1671_v31 = vsel %vm173_vm0, %v1669_v29, 0.0 }
 0xf34   :  { %1672 = vadd.xlane.f32.xlu0 %v1671_v31 }
 0xf46   :  { %v1666_v32 = vpop.f32.mrf.mxu3 }
 0xf47   :  { %v1667_v33 = vadd.f32 %v1666_v32, %v1639_v25  ;;  %v1721_v25 = vperm.slane %v2679_v44, 1 }
 0xf49   :  { %v1670_v34 = vadd.f32 %v1667_v33, %v2723_v46  ;;  %v237_v46 = vld [vmem:[%s2938_s12 + $0x38] sm:$0xff] }
 0xf4a   :  { %1740 = vmatpush.msra.mxu0 %v237_v46 }
 0xf4b   :  { %v1674_v35 = vsel %vm173_vm0, %v1670_v34, 0.0 }
 0xf4c   :  { %1675 = vadd.xlane.f32.xlu1 %v1674_v35  ;;  %1741 = vmatpush.msra.mxu0 %v236_v45 }
 0xf4e   :  { %1742 = vmatpush.msra.mxu0 %v235_v48 }
 0xf50   :  { %1743 = vmatpush.msra.mxu0 %v234_v50 }
 0xfa7   :  { %v1673_v36 = vpop.xlane.xlu0 %1672 }
 0xfa8   :  { %v1677_v38 = vmul.f32 %v1673_v36, %v2621_v21 }
 0xfaa   :  { %v1679_v39 = vsub.f32 %v1669_v29, %v1677_v38 }
 0xfac   :  { %v1681_v40 = vmul.f32 %v1679_v39, %v1679_v39 }
 0xfae   :  { %v1683_v13 = vsel %vm173_vm0, %v1681_v40, 0.0 }
 0xfaf   :  { %1684 = vadd.xlane.f32.xlu2 %v1683_v13 }
 0xfbf   :  { %v1676_v41 = vpop.xlane.xlu1 %1675 }
 0xfc0   :  { %v1678_v37 = vmul.f32 %v1676_v41, %v2621_v21 }
 0xfc2   :  { %v1680_v42 = vsub.f32 %v1670_v34, %v1678_v37  ;;  %v1753_v34 = vperm.slane %v2687_v52, 1 }
 0xfc4   :  { %v1682_v43 = vmul.f32 %v1680_v42, %v1680_v42 }
 0xfc6   :  { %v1686_v54 = vsel %vm173_vm0, %v1682_v43, 0.0 }
 0xfc7   :  { %1687 = vadd.xlane.f32.xlu0 %v1686_v54 }
0x1022   :  { %v1685_v53 = vpop.xlane.xlu2 %1684 }
0x1023   :  { %v1689_v14 = vmul.f32 %v1685_v53, %v2621_v21 }
0x1025   :  { %v1691_v47 = vadd.f32 1e-05, %v1689_v14 }
0x1027   :  { %2100 = vrsqrt.f32 %v1691_v47  ;;  %vm1699_vm2 = vweird.f32 %v1691_v47 }
0x102d   :  { %v2101_v55 = vpop.eup %2100 }
0x102e   :  { %v1694_v56 = vmul.f32 %v2101_v55, %v1691_v47  ;;  %vm1700_vm1 = vweird.f32 %v2101_v55 }
0x102f   :  { %vm1701_vm3 = vmor %vm1699_vm2, %vm1700_vm1 }
0x1030   :  { %v1695_v57 = vmul.f32 %v2101_v55, %v1694_v56 }
0x1032   :  { %v1696_v18 = vmul.f32 0.5, %v1695_v57 }
0x1034   :  { %v1697_v58 = vsub.f32 1.5, %v1696_v18 }
0x1036   :  { %v1698_v59 = vmul.f32 %v2101_v55, %v1697_v58 }
0x1038   :  { %v1702_v63 = vsel %vm1701_vm3, %v2101_v55, %v1698_v59 }
0x1039   :  { %v1713_v1 = vmul.f32 %v1702_v63, %v1679_v39  ;;  %v1852_v63 = vld [vmem:[#allocation13 + $0x8] sm:$0xff] }
0x103a   :  { %v1688_v2 = vpop.xlane.xlu0 %1687  ;;  %1879 = vmatpush.msra.mxu2 %v1852_v63 }
0x103b   :  { %v1690_v49 = vmul.f32 %v1688_v2, %v2621_v21  ;;  %v1716_v4 = vmul.f32 %v1715_v62, %v1713_v1 }
0x103c   :  { %1880 = vmatpush.msra.mxu2 %v1851_v0 }
0x103d   :  { %v1692_v17 = vadd.f32 1e-05, %v1690_v49  ;;  %v1719_v6 = vadd.f32 %v1718_v3, %v1716_v4  ;;  %v1829_v49 = vperm.slane %v2713_v20, 1 }
0x103f   :  { %2102 = vrsqrt.f32 %v1692_v17  ;;  %1968 = vmatmul.msk.f32.vlgmr.msra.gmra.mxu0 %vm173_vm0, %v1719_v6  ;;  %vm1709_vm7 = vweird.f32 %v1692_v17 }
0x1045   :  { %v2103_v26 = vpop.eup %2102 }
0x1046   :  { %v1704_v7 = vmul.f32 %v2103_v26, %v1692_v17  ;;  %vm1710_vm6 = vweird.f32 %v2103_v26  ;;  %v1832_v17 = vperm.slane %v2715_v30, 1 }
0x1047   :  { %vm1711_vm8 = vmor %vm1709_vm7, %vm1710_vm6 }
0x1048   :  { %v1705_v8 = vmul.f32 %v2103_v26, %v1704_v7 }
0x104a   :  { %v1706_v9 = vmul.f32 0.5, %v1705_v8 }
0x104c   :  { %v1707_v10 = vsub.f32 1.5, %v1706_v9 }
0x104e   :  { %v1708_v11 = vmul.f32 %v2103_v26, %v1707_v10 }
0x1050   :  { %v1712_v12 = vsel %vm1711_vm8, %v2103_v26, %v1708_v11 }
0x1051   :  { %v1714_v15 = vmul.f32 %v1712_v12, %v1680_v42 }
0x1053   :  { %v1717_v16 = vmul.f32 %v1715_v62, %v1714_v15 }
0x1055   :  { %v1720_v23 = vadd.f32 %v1718_v3, %v1717_v16 }
0x1057   :  { %1969 = vmatmul.msk.f32.gmra.mxu0 %vm173_vm0, %v1720_v23 }
0x10bc   :  { %v1745_v27 = vpop.f32.mrf.mxu0 }
0x10bd   :  { %v1746_v28 = vadd.f32 %v1745_v27, %v1721_v25 }
0x10bf   :  { %v1751_v29 = vmax.f32 %v1746_v28, 0.0 }
0x10c1   :  { %1970 = vmatmul.msk.f32.vlgmr.msra.gmra.mxu1 %vm969_vm11, %v1751_v29 }
0x10d4   :  { %v1748_v31 = vpop.f32.mrf.mxu0 }
0x10d5   :  { %v1749_v32 = vadd.f32 %v1748_v31, %v1721_v25 }
0x10d7   :  { %v1752_v33 = vmax.f32 %v1749_v32, 0.0 }
0x10d9   :  { %1971 = vmatmul.msk.f32.gmra.mxu1 %vm969_vm11, %v1752_v33 }
0x113e   :  { %v1777_v35 = vpop.f32.mrf.mxu1 }
0x113f   :  { %v1778_v36 = vadd.f32 %v1777_v35, %v1753_v34 }
0x1141   :  { %v1783_v38 = vadd.f32 %v1778_v36, %v1719_v6 }
0x1143   :  { %v1785_v39 = vsel %vm173_vm0, %v1783_v38, 0.0 }
0x1144   :  { %1786 = vadd.xlane.f32.xlu1 %v1785_v39  ;;  %v2025_v39 = vld [vmem:[%s2943_s17] ss:$0 sm:$0xff] }
0x1156   :  { %v1780_v40 = vpop.f32.mrf.mxu1 }
0x1157   :  { %v1781_v44 = vadd.f32 %v1780_v40, %v1753_v34 }
0x1159   :  { %v1784_v13 = vadd.f32 %v1781_v44, %v1720_v23 }
0x115b   :  { %v1788_v41 = vsel %vm173_vm0, %v1784_v13, 0.0 }
0x115c   :  { %1789 = vadd.xlane.f32.xlu0 %v1788_v41 }
0x11b7   :  { %v1787_v37 = vpop.xlane.xlu1 %1786 }
0x11b8   :  { %v1791_v42 = vmul.f32 %v1787_v37, %v2621_v21 }
0x11ba   :  { %v1793_v43 = vsub.f32 %v1783_v38, %v1791_v42 }
0x11bc   :  { %v1795_v54 = vmul.f32 %v1793_v43, %v1793_v43 }
0x11be   :  { %v1797_v46 = vsel %vm173_vm0, %v1795_v54, 0.0 }
0x11bf   :  { %1798 = vadd.xlane.f32.xlu1 %v1797_v46 }
0x11cf   :  { %v1790_v52 = vpop.xlane.xlu0 %1789 }
0x11d0   :  { %v1792_v45 = vmul.f32 %v1790_v52, %v2621_v21 }
0x11d2   :  { %v1794_v48 = vsub.f32 %v1784_v13, %v1792_v45 }
0x11d4   :  { %v1796_v50 = vmul.f32 %v1794_v48, %v1794_v48 }
0x11d6   :  { %v1800_v53 = vsel %vm173_vm0, %v1796_v50, 0.0 }
0x11d7   :  { %1801 = vadd.xlane.f32.xlu2 %v1800_v53 }
0x1232   :  { %v1799_v14 = vpop.xlane.xlu1 %1798 }
0x1233   :  { %v1803_v47 = vmul.f32 %v1799_v14, %v2621_v21 }
0x1235   :  { %v1805_v55 = vadd.f32 1e-05, %v1803_v47 }
0x1237   :  { %2104 = vrsqrt.f32 %v1805_v55  ;;  %vm1813_vm10 = vweird.f32 %v1805_v55 }
0x123d   :  { %v2105_v56 = vpop.eup %2104 }
0x123e   :  { %v1808_v57 = vmul.f32 %v2105_v56, %v1805_v55  ;;  %vm1814_vm9 = vweird.f32 %v2105_v56 }
0x123f   :  { %vm1815_vm11 = vmor %vm1813_vm10, %vm1814_vm9 }
0x1240   :  { %v1809_v18 = vmul.f32 %v2105_v56, %v1808_v57 }
0x1242   :  { %v1810_v58 = vmul.f32 0.5, %v1809_v18 }
0x1244   :  { %v1811_v59 = vsub.f32 1.5, %v1810_v58 }
0x1246   :  { %v1812_v62 = vmul.f32 %v2105_v56, %v1811_v59 }
0x1248   :  { %v1816_v1 = vsel %vm1815_vm11, %v2105_v56, %v1812_v62 }
0x1249   :  { %v1827_v51 = vmul.f32 %v1816_v1, %v1793_v43 }
0x124a   :  { %v1802_v2 = vpop.xlane.xlu2 %1801 }
0x124b   :  { %v1804_v3 = vmul.f32 %v1802_v2, %v2621_v21  ;;  %v1830_v5 = vmul.f32 %v1829_v49, %v1827_v51 }
0x124d   :  { %v1806_v4 = vadd.f32 1e-05, %v1804_v3  ;;  %v1833_v26 = vadd.f32 %v1832_v17, %v1830_v5 }
0x124f   :  { %2106 = vrsqrt.f32 %v1806_v4  ;;  %v1835_v9 = vsel %vm173_vm0, %v1833_v26, 0.0  ;;  %vm1823_vm13 = vweird.f32 %v1806_v4 }
0x1250   :  { %v1836_v12 = vrot.slane %v1835_v9, 4 }
0x1252   :  { %v1837_v15 = vadd.f32 %v1836_v12, %v1835_v9 }
0x1254   :  { %v1838_v19 = vrot.slane %v1837_v15, 2 }
0x1255   :  { %v2107_v6 = vpop.eup %2106 }
0x1256   :  { %v1818_v7 = vmul.f32 %v2107_v6, %v1806_v4  ;;  %vm1824_vm12 = vweird.f32 %v2107_v6  ;;  %v1839_v24 = vadd.f32 %v1838_v19, %v1837_v15 }
0x1257   :  { %vm1825_vm14 = vmor %vm1823_vm13, %vm1824_vm12 }
0x1258   :  { %v1819_v8 = vmul.f32 %v2107_v6, %v1818_v7  ;;  %v1840_v28 = vrot.slane %v1839_v24, 1 }
0x125a   :  { %v1820_v10 = vmul.f32 0.5, %v1819_v8  ;;  %v1841_v32 = vadd.f32 %v1840_v28, %v1839_v24 }
0x125c   :  { %v1821_v11 = vsub.f32 1.5, %v1820_v10  ;;  %v1849_v35 = vmul.f32 0.125, %v1841_v32 }
0x125e   :  { %v1822_v21 = vmul.f32 %v2107_v6, %v1821_v11 }
0x1260   :  { %v1826_v20 = vsel %vm1825_vm14, %v2107_v6, %v1822_v21 }
0x1261   :  { %v1828_v16 = vmul.f32 %v1826_v20, %v1794_v48 }
0x1263   :  { %v1831_v23 = vmul.f32 %v1829_v49, %v1828_v16 }
0x1265   :  { %v1834_v30 = vadd.f32 %v1832_v17, %v1831_v23 }
0x1267   :  { %v1842_v22 = vsel %vm173_vm0, %v1834_v30, 0.0 }
0x1268   :  { %v1843_v25 = vrot.slane %v1842_v22, 4 }
0x126a   :  { %v1844_v27 = vadd.f32 %v1843_v25, %v1842_v22 }
0x126c   :  { %v1845_v29 = vrot.slane %v1844_v27, 2 }
0x126e   :  { %v1846_v31 = vadd.f32 %v1845_v29, %v1844_v27 }
0x1270   :  { %v1847_v33 = vrot.slane %v1846_v31, 1 }
0x1272   :  { %v1848_v34 = vadd.f32 %v1847_v33, %v1846_v31 }
0x1274   :  { %v1850_v36 = vmul.f32 0.125, %v1848_v34 }
0x1276   :  { %v1862_v38 = vsel %vm1861_vm15, %v1850_v36, %v1849_v35 }
0x1277   :  { %1972 = vmatmul.msk.f32.vlgmr.msra.gmra.mxu2 %vm173_vm0, %v1862_v38 }
0x12fa   :  { %v1882_v40 = vpop.f32.mrf.mxu2 }
0x12fb   :  { %v1883_v44 = vadd.f32 %v2025_v39, %v1882_v40 }
0x12fd   :  { %1885 = vst [vmem:[#allocation14] sm:$0x3] %v1883_v44 }
0x12fe   :  { %1896 = dma.vmem_to_hbm [thread:$0]  %s1892_s0, 32, %s1894_s20, [#allocation4]  }
0x12ff   :  { %2308 = dma.done.wait [#allocation4], 32  }
0x1300   :  { %2309 = vsyncadd [#allocation4], 4294967264 }
0x1301   :  { %1901 = vsyncpa [#allocation3], 1 }
0x1302   :  { %1902 = vsyncpa [#allocation6], 1 }
0x1303   :  { %1903 = vsyncpa [#allocation9], 1 }
0x1304   :  { %1904 = vsyncpa [#allocation12], 1 }
0x1305   :  { %1905 = vsyncpa [#allocation4], 1 }

</bundles_post_ra>
